<compile_context>
chip_gen: v7x
topology: tpu7x:2x2x1
jax: 0.10.0
libtpu: 0.0.40
codegen_flags: <defaults>
</compile_context>

<pallas_src>
import jax
import jax.numpy as jnp
from jax.experimental import pallas as pl
from jax.experimental.pallas import tpu as pltpu


def _cbam_kernel(x_ref, w1t_ref, w2t_ref, k_ref, o_ref):
    """Fused CBAM forward for one block of TB images.

    x_ref : (1, TB, C, HW)  f32   -- input feature maps, flattened spatial
    w1t   : (C, CH)         f32   -- fc1 weight, pre-transposed
    w2t   : (CH, C)         f32   -- fc2 weight, pre-transposed
    k_ref : (2*HW, HW)      bf16  -- folded 7x7 'same' conv, rows = [mean-K | max-K]
    o_ref : (1, TB, HW)     f32   -- spatial attention map
    """
    x = x_ref[0]                                   # (TB, C, HW)
    tb, c, hw = x.shape

    # ---- Channel attention: global avg/max pool -> shared MLP (batched) -> sigmoid ----
    # TODO(synk): for HW not a multiple of 128 or C not a multiple of 8, pad the max
    # reductions with -inf explicitly before generalizing beyond aligned shapes.
    avg = jnp.sum(x, axis=2) * (1.0 / hw)          # (TB, C)
    mx = jnp.max(x, axis=2)                        # (TB, C)
    pooled = jnp.concatenate([avg, mx], axis=0)    # (2*TB, C): [avg rows | max rows]
    h = jnp.maximum(
        jnp.dot(pooled, w1t_ref[...], preferred_element_type=jnp.float32), 0.0)  # (2*TB, CH)
    logits = jnp.dot(h, w2t_ref[...], preferred_element_type=jnp.float32)        # (2*TB, C)
    ca = jax.nn.sigmoid(logits[:tb] + logits[tb:])                               # (TB, C)

    # ---- Channel-wise scaling + spatial pooling (mean / max over channels) ----
    x_ca = x * ca[:, :, None]                      # (TB, C, HW)
    sp_mean = jnp.sum(x_ca, axis=1) * (1.0 / c)    # (TB, HW)
    sp_max = jnp.max(x_ca, axis=1)                 # (TB, HW)
    sp = jnp.concatenate([sp_mean, sp_max], axis=1).astype(k_ref.dtype)  # (TB, 2*HW) bf16

    # ---- 7x7 zero-padded 'same' conv over [mean, max] + sigmoid: ONE K=2*HW matmul ----
    conv = jnp.dot(sp, k_ref[...], preferred_element_type=jnp.float32)   # (TB, HW)
    o_ref[0] = jax.nn.sigmoid(conv)                                      # lane-dense slab


def _build_conv_matrix(w_spatial, hh, ww):
    """Fold the (1, 2, 7, 7) conv weights into one stacked (2*HW, HW) matrix K with
    K[p, q]      = w[0, 0, pi-qi+3, pj-qj+3]   (mean channel)
    K[HW+p, q]   = w[0, 1, pi-qi+3, pj-qj+3]   (max channel)
    when the offset lies inside the 7x7 window (zero padding encoded as zeros), so
    conv[q] = [sp_mean | sp_max] @ K."""
    hw = hh * ww
    p = jnp.arange(hw)
    q = jnp.arange(hw)
    pi = (p // ww)[:, None]
    pj = (p % ww)[:, None]
    qi = (q // ww)[None, :]
    qj = (q % ww)[None, :]
    di = pi - qi + 3
    dj = pj - qj + 3
    valid = (di >= 0) & (di < 7) & (dj >= 0) & (dj < 7)
    dic = jnp.clip(di, 0, 6)
    djc = jnp.clip(dj, 0, 6)
    w = w_spatial.astype(jnp.float32)
    k0 = jnp.where(valid, w[0, 0, dic, djc], 0.0)              # (HW, HW) -- mean channel
    k1 = jnp.where(valid, w[0, 1, dic, djc], 0.0)              # (HW, HW) -- max channel
    return jnp.concatenate([k0, k1], axis=0)                   # (2*HW, HW)


def _pick_block_batch(n, c, hw, vmem_budget_bytes=8 << 20):
    """Largest divisor of n such that the (double-buffered) x block fits the budget and
    the grid has >= 2 steps (keeps both v7x TensorCores busy); prefer sublane-aligned TB."""
    cands = [tb for tb in range(1, n + 1)
             if n % tb == 0
             and (n < 2 or n // tb >= 2)
             and 2 * tb * c * hw * 4 <= vmem_budget_bytes]
    if not cands:
        return 1
    aligned = [tb for tb in cands if tb % 8 == 0]
    return max(aligned) if aligned else max(cands)


def cbam_attention(x, w_fc1, w_fc2, w_spatial, *, block_batch=None):
    """x: (N, C, H, W) f32 NCHW; w_fc1: (C//16, C); w_fc2: (C, C//16);
    w_spatial: (1, 2, 7, 7). Returns the spatial attention map (N, 1, H, W),
    matching CBAM_attention.forward (which returns x_sa only)."""
    n, c, hh, ww = x.shape
    chid = w_fc1.shape[0]
    hw = hh * ww

    tb = block_batch if block_batch is not None else _pick_block_batch(n, c, hw)
    assert n % tb == 0, (n, tb)
    grid_n = n // tb

    # Blocked layouts: trailing dims of every block equal the full array dims.
    x_blk = x.reshape(grid_n, tb, c, hw).astype(jnp.float32)
    w1t = w_fc1.astype(jnp.float32).T                          # (C, CH)
    w2t = w_fc2.astype(jnp.float32).T                          # (CH, C)
    k_mat = _build_conv_matrix(w_spatial, hh, ww).astype(jnp.bfloat16)  # (2*HW, HW) bf16

    # Advisory cost estimate for XLA's scheduler around this small custom call.
    flops = int(2 * n * (2 * hw) * hw          # fused spatial conv matmul
                + 8 * n * c * chid             # batched channel-attention MLP
                + 6 * n * c * hw)              # scaling + reductions
    transcendentals = int(n * (c + hw))        # sigmoids
    bytes_accessed = int(x_blk.size * 4 + k_mat.size * 2
                         + (w1t.size + w2t.size) * 4 + n * hw * 4)

    # Scoped-VMEM budget: x block + constants + output with their (double) buffer counts.
    block_bytes = ((tb * c * hw * 4) * 2            # x block, 2 buffers
                   + k_mat.size * 2 * 2             # bf16 folded conv, 2 buffers
                   + (w1t.size + w2t.size) * 4 * 2  # MLP weights, 2 buffers
                   + (tb * hw * 4) * 2)             # output block, 2 buffers
    vmem_limit = int(min(max(block_bytes + (8 << 20), 32 << 20), 48 << 20))

    out_blk = pl.pallas_call(
        _cbam_kernel,
        out_shape=jax.ShapeDtypeStruct((grid_n, tb, hw), jnp.float32),
        grid=(grid_n,),
        in_specs=[
            pl.BlockSpec((1, tb, c, hw), lambda i: (i, 0, 0, 0)),   # x (TB images / step)
            pl.BlockSpec((c, chid), lambda i: (0, 0)),              # fc1^T (resident)
            pl.BlockSpec((chid, c), lambda i: (0, 0)),              # fc2^T (resident)
            pl.BlockSpec((2 * hw, hw), lambda i: (0, 0)),           # folded conv (resident)
        ],
        out_specs=pl.BlockSpec((1, tb, hw), lambda i: (i, 0, 0)),   # lane-dense (TB, HW) slab
        compiler_params=pltpu.CompilerParams(
            dimension_semantics=("parallel",),                      # batch axis -> both TCs
            vmem_limit_bytes=vmem_limit),
        cost_estimate=pl.CostEstimate(flops=flops,
                                      transcendentals=transcendentals,
                                      bytes_accessed=bytes_accessed),
    )(x_blk, w1t, w2t, k_mat)

    return out_blk.reshape(n, 1, hh, ww)


def _reference(x, w_fc1, w_fc2, w_spatial):
    """Pure-JAX reference matching the PyTorch forward semantics."""
    avg = jnp.mean(x, axis=(2, 3), keepdims=True)
    mx = jnp.max(x, axis=(2, 3), keepdims=True)

    def mlp(v):
        h = jnp.einsum("oc,nchw->nohw", w_fc1, v)
        h = jnp.maximum(h, 0.0)
        return jnp.einsum("oc,nchw->nohw", w_fc2, h)

    ca = jax.nn.sigmoid(mlp(avg) + mlp(mx))
    x_ca = ca * x
    sp = jnp.concatenate(
        [jnp.mean(x_ca, axis=1, keepdims=True), jnp.max(x_ca, axis=1, keepdims=True)],
        axis=1)
    conv = jax.lax.conv_general_dilated(
        sp, w_spatial, window_strides=(1, 1), padding=((3, 3), (3, 3)),
        dimension_numbers=("NCHW", "OIHW", "NCHW"))
    return jax.nn.sigmoid(conv)


if __name__ == "__main__":
    key = jax.random.PRNGKey(0)
    k1, k2, k3, k4 = jax.random.split(key, 4)
    # in_planes must be >= 16 since fc1 maps C -> C // 16 (hard-coded in the module).
    # N=16 exercises the TB-batched path (TB=8 -> grid of 2 steps).
    N, C, H, W = 16, 32, 16, 16
    CH = C // 16

    x = jax.random.normal(k1, (N, C, H, W), dtype=jnp.float32)
    w_fc1 = jax.random.normal(k2, (CH, C), dtype=jnp.float32) * 0.1      # fc1 (1x1 conv, no bias)
    w_fc2 = jax.random.normal(k3, (C, CH), dtype=jnp.float32) * 0.1      # fc2 (1x1 conv, no bias)
    w_spatial = jax.random.normal(k4, (1, 2, 7, 7), dtype=jnp.float32) * 0.1  # 7x7 conv, no bias

    out = jax.block_until_ready(cbam_attention(x, w_fc1, w_fc2, w_spatial))
    assert out.shape == (N, 1, H, W), out.shape

    ref = _reference(x, w_fc1, w_fc2, w_spatial)
    max_err = float(jnp.max(jnp.abs(out - ref)))
    assert max_err < 2e-2, f"max abs err too large: {max_err}"

    print("KERNEL_OK")
</pallas_src>

<mosaic_0001>
module attributes {stable_mosaic.version = 11 : i64} {
  func.func @_cbam_kernel(%arg0: i32, %arg1: memref<1x8x32x256xf32, #tpu.memory_space<vmem>>, %arg2: memref<32x2xf32, #tpu.memory_space<vmem>>, %arg3: memref<2x32xf32, #tpu.memory_space<vmem>>, %arg4: memref<512x256xbf16, #tpu.memory_space<vmem>>, %arg5: memref<1x8x256xf32, #tpu.memory_space<vmem>>) attributes {dimension_semantics = [#tpu.dimension_semantics<parallel>], iteration_bounds = array<i64: 2>, scalar_prefetch = 0 : i64, scratch_operands = 0 : i64, tpu.core_type = #tpu.core_type<tc>, window_params = [{transform_indices = @transform_0, window_bounds = array<i64: 1, 8, 32, 256>}, {pipeline_mode = #tpu.pipeline_mode<synchronous>, transform_indices = @transform_1, window_bounds = array<i64: 32, 2>}, {pipeline_mode = #tpu.pipeline_mode<synchronous>, transform_indices = @transform_2, window_bounds = array<i64: 2, 32>}, {pipeline_mode = #tpu.pipeline_mode<synchronous>, transform_indices = @transform_3, window_bounds = array<i64: 512, 256>}, {transform_indices = @transform_4, window_bounds = array<i64: 1, 8, 256>}]} {
    %c0 = arith.constant 0 : index
    %c0_0 = arith.constant 0 : index
    %c0_1 = arith.constant 0 : index
    %c0_2 = arith.constant 0 : index
    %0 = vector.load %arg1[%c0, %c0_0, %c0_1, %c0_2] : memref<1x8x32x256xf32, #tpu.memory_space<vmem>>, vector<1x8x32x256xf32>
    %1 = vector.shape_cast %0 : vector<1x8x32x256xf32> to vector<8x32x256xf32>
    %cst = arith.constant dense<0.000000e+00> : vector<8x32xf32>
    %2 = vector.multi_reduction <add>, %1, %cst [2] : vector<8x32x256xf32> to vector<8x32xf32>
    %cst_3 = arith.constant 3.906250e-03 : f32
    %3 = vector.broadcast %cst_3 : f32 to vector<8x32xf32>
    %4 = arith.mulf %2, %3 : vector<8x32xf32>
    %cst_4 = arith.constant dense<0xFF800000> : vector<8x32xf32>
    %5 = vector.multi_reduction <maximumf>, %1, %cst_4 [2] : vector<8x32x256xf32> to vector<8x32xf32>
    %6 = tpu.concatenate %4, %5 in 0 : vector<8x32xf32>, vector<8x32xf32> -> vector<16x32xf32>
    %c0_5 = arith.constant 0 : index
    %c0_6 = arith.constant 0 : index
    %7 = vector.load %arg2[%c0_5, %c0_6] : memref<32x2xf32, #tpu.memory_space<vmem>>, vector<32x2xf32>
    %cst_7 = arith.constant dense<0.000000e+00> : vector<16x2xf32>
    %8 = tpu.matmul %6, %7, %cst_7 {dimension_numbers = #tpu.dot_dimension_numbers<[1], [0], [0], [1], [0, 0, 1, 1], [], []>} : vector<16x32xf32>, vector<32x2xf32>, vector<16x2xf32> -> vector<16x2xf32>
    %cst_8 = arith.constant 0.000000e+00 : f32
    %9 = vector.broadcast %cst_8 : f32 to vector<16x2xf32>
    %10 = arith.maximumf %8, %9 : vector<16x2xf32>
    %c0_9 = arith.constant 0 : index
    %c0_10 = arith.constant 0 : index
    %11 = vector.load %arg3[%c0_9, %c0_10] : memref<2x32xf32, #tpu.memory_space<vmem>>, vector<2x32xf32>
    %cst_11 = arith.constant dense<0.000000e+00> : vector<16x32xf32>
    %12 = tpu.matmul %10, %11, %cst_11 {dimension_numbers = #tpu.dot_dimension_numbers<[1], [0], [0], [1], [0, 0, 1, 1], [], []>} : vector<16x2xf32>, vector<2x32xf32>, vector<16x32xf32> -> vector<16x32xf32>
    %13 = vector.extract_strided_slice %12 {offsets = [0, 0], sizes = [8, 32], strides = [1, 1]} : vector<16x32xf32> to vector<8x32xf32>
    %14 = vector.extract_strided_slice %12 {offsets = [8, 0], sizes = [8, 32], strides = [1, 1]} : vector<16x32xf32> to vector<8x32xf32>
    %15 = arith.addf %13, %14 : vector<8x32xf32>
    %16 = arith.negf %15 : vector<8x32xf32>
    %17 = math.exp %16 : vector<8x32xf32>
    %cst_12 = arith.constant 1.000000e+00 : f32
    %18 = vector.broadcast %cst_12 : f32 to vector<8x32xf32>
    %19 = arith.addf %18, %17 : vector<8x32xf32>
    %20 = arith.divf %18, %19 : vector<8x32xf32>
    %21 = vector.shape_cast %20 : vector<8x32xf32> to vector<8x32x1xf32>
    %22 = vector.broadcast %21 : vector<8x32x1xf32> to vector<8x32x256xf32>
    %23 = arith.mulf %1, %22 : vector<8x32x256xf32>
    %cst_13 = arith.constant dense<0.000000e+00> : vector<8x256xf32>
    %24 = vector.multi_reduction <add>, %23, %cst_13 [1] : vector<8x32x256xf32> to vector<8x256xf32>
    %cst_14 = arith.constant 3.125000e-02 : f32
    %25 = vector.broadcast %cst_14 : f32 to vector<8x256xf32>
    %26 = arith.mulf %24, %25 : vector<8x256xf32>
    %cst_15 = arith.constant dense<0xFF800000> : vector<8x256xf32>
    %27 = vector.multi_reduction <maximumf>, %23, %cst_15 [1] : vector<8x32x256xf32> to vector<8x256xf32>
    %28 = tpu.concatenate %26, %27 in 1 : vector<8x256xf32>, vector<8x256xf32> -> vector<8x512xf32>
    %29 = arith.truncf %28 : vector<8x512xf32> to vector<8x512xbf16>
    %c0_16 = arith.constant 0 : index
    %c0_17 = arith.constant 0 : index
    %30 = vector.load %arg4[%c0_16, %c0_17] : memref<512x256xbf16, #tpu.memory_space<vmem>>, vector<512x256xbf16>
    %cst_18 = arith.constant dense<0.000000e+00> : vector<8x256xf32>
    %31 = tpu.matmul %29, %30, %cst_18 {dimension_numbers = #tpu.dot_dimension_numbers<[1], [0], [0], [1], [0, 0, 1, 1], [], []>} : vector<8x512xbf16>, vector<512x256xbf16>, vector<8x256xf32> -> vector<8x256xf32>
    %32 = arith.negf %31 : vector<8x256xf32>
    %33 = math.exp %32 : vector<8x256xf32>
    %cst_19 = arith.constant 1.000000e+00 : f32
    %34 = vector.broadcast %cst_19 : f32 to vector<8x256xf32>
    %35 = arith.addf %34, %33 : vector<8x256xf32>
    %36 = arith.divf %34, %35 : vector<8x256xf32>
    %c0_20 = arith.constant 0 : index
    %c0_21 = arith.constant 0 : index
    %c0_22 = arith.constant 0 : index
    %37 = vector.load %arg5[%c0_20, %c0_21, %c0_22] : memref<1x8x256xf32, #tpu.memory_space<vmem>>, vector<1x8x256xf32>
    %38 = vector.shape_cast %37 : vector<1x8x256xf32> to vector<8x256xf32>
    %39 = vector.shape_cast %36 : vector<8x256xf32> to vector<1x8x256xf32>
    tpu.vector_store %arg5[%c0_20, %c0_21, %c0_22], %39 {strides = array<i32>} : memref<1x8x256xf32, #tpu.memory_space<vmem>>, vector<1x8x256xf32>,
    return
  }
  func.func @transform_0(%arg0: i32) -> (i32, i32, i32, i32) {
    %c0_i32 = arith.constant 0 : i32
    %c0_i32_0 = arith.constant 0 : i32
    %c0_i32_1 = arith.constant 0 : i32
    %c0_i32_2 = arith.constant 0 : i32
    return %arg0, %c0_i32, %c0_i32_0, %c0_i32_1 : i32, i32, i32, i32
  }
  func.func @transform_1(%arg0: i32) -> (i32, i32) {
    %c0_i32 = arith.constant 0 : i32
    %c0_i32_0 = arith.constant 0 : i32
    %c0_i32_1 = arith.constant 0 : i32
    return %c0_i32, %c0_i32_0 : i32, i32
  }
  func.func @transform_2(%arg0: i32) -> (i32, i32) {
    %c0_i32 = arith.constant 0 : i32
    %c0_i32_0 = arith.constant 0 : i32
    %c0_i32_1 = arith.constant 0 : i32
    return %c0_i32, %c0_i32_0 : i32, i32
  }
  func.func @transform_3(%arg0: i32) -> (i32, i32) {
    %c0_i32 = arith.constant 0 : i32
    %c0_i32_0 = arith.constant 0 : i32
    %c0_i32_1 = arith.constant 0 : i32
    return %c0_i32, %c0_i32_0 : i32, i32
  }
  func.func @transform_4(%arg0: i32) -> (i32, i32, i32) {
    %c0_i32 = arith.constant 0 : i32
    %c0_i32_0 = arith.constant 0 : i32
    %c0_i32_1 = arith.constant 0 : i32
    return %arg0, %c0_i32, %c0_i32_0 : i32, i32, i32
  }
}

</mosaic_0001>

<bundles_post_ra>
// kernel: tpu_custom_call.1
= control target key start
LH: loop header
LB: loop body
LE: loop exit
PB: predicated region body
PF: predicated region fallthrough
CT: control target
= control target key end

     0   :  { %9 = vsyncpa [#allocation3], 0  ;;  %s3766_s0 = inlined_call_operand.hbm [shape: f32[2,8,32,256], index: 0, kind: input, shape index: {}]   ;;  %s3767_s1 = inlined_call_operand.vmem [shape: f32[32,2], index: 1, kind: input, shape index: {}]   ;;  %s3768_s2 = inlined_call_operand.vmem [shape: f32[2,32], index: 2, kind: input, shape index: {}]   ;;  %s3769_s3 = inlined_call_operand.hbm [shape: bf16[512,256], index: 3, kind: input, shape index: {}]   ;;  %s3770_s4 = inlined_call_operand.hbm [shape: f32[2,8,256], index: 4, kind: output, shape index: {}]  }
   0x1   :  { %11 = vsyncpa [#allocation3 + $0x1], 0 }
   0x2   :  { %12 = vsyncpa [#allocation6], 0 }
   0x3   :  { %13 = vsyncpa [#allocation4], 0 }
   0x4   :  { %15 = vsyncpa [#allocation4 + $0x1], 0  ;;  %s2779_s15 = smov 0   ;;  %s2781_s16 = smov 0  }
   0x5   :  { %s2783_s17 = smov 0   ;;  %s2785_s18 = smov 0  }
   0x6 LB: > { %s2800_s19 = sadd.s32 4294967295, %s2745_s18   ;;  %s2259_s20 = sadd.s32 4294967294, %s2745_s18   ;;  %s2745_s18 = sphi %s2785_s18, %s3790_s18   ;;  %s2741_s17 = sphi %s2783_s17, %s3789_s17   ;;  %s2737_s16 = sphi %s2781_s16, %s3788_s16   ;;  %s2733_s15 = sphi %s2779_s15, %s3787_s15  }
   0x7   : > { %p41_p0 = scmp.ne.s32.totalorder %s2737_s16, %s2733_s15  ;;  %p3771_p1 = scmp.eq.s32.totalorder %s2800_s19, 0 }
   0x8   : > { %p134_p3 = scmp.eq.s32.totalorder %s2259_s20, 1  ;;  %p2260_p5 = scmp.ge.s32.totalorder %s2745_s18, 1 }
   0x9   : > { %p2809_p4 = por %p3771_p1, %p41_p0  ;;  %p141_p7 = scmp.lt.s32.totalorder %s2745_s18, 3 }
   0xa   : > { %p2814_p6 = por %p134_p3, %p41_p0  ;;  %s2747_s24 = smov [#allocation5]  }
   0xb   : > { %s3774_s21 = scalar_select %p2809_p4, 1, 0 }
   0xc   : > { %s3775_s22 = scalar_select %p2814_p6, 1, 0 }
   0xd   : > { %p2819_p8 = pnand %p2260_p5, %p141_p7  ;;  %s159_s25 = sshll.u32 %s2747_s24, 4  ;;  %s2823_s25 = int_to_ptr.vmem [resolvable:$true] %s159_s25 }
   0xe   : > { %s2835_s27 = sadd.s32 1, %s2745_s18   ;;  %s28_s28 = sadd.s32 1, %s2741_s17 }
   0xf   : > { %s3776_s23 = scalar_select %p2819_p8, 1, 0 }
  0x10   : > { %p2392_p9 = pneg %p2819_p8  ;;  %s25_s29 = ssub.s32 %s2745_s18, %s2835_s27 }
  0x11   : > { %s2617_s6 = scalar_lea.hbm %s3769_s3, 8192 }
  0x12   : > { %p2830_p11 = pnand %p2392_p9, %p3771_p1  ;;  %p2618_p12 = scmp.ne.s32.totalorder %s3769_s3, %s2617_s6 }
  0x13   : > { %p2624_p5 = scmp.lt.u32.totalorder %s2617_s6, %s3769_s3 }
  0x14   : > { %p2619_p13 = pneg %p2830_p11 }
  0x16   : > { %p2620_p0 = pnand %p2619_p13, %p2618_p12 }
  0x18   : > { %p2621_p3 = pneg %p2620_p0 }
  0x1a   : > { %p2626_p7 = pnand %p2624_p5, %p2621_p3 }
  0x1c   : > { %2629 = shalt.err (!%p2626_p7)
}
  0x1d   : > { %s2630_s11 = scalar_lea.vmem %s2823_s25, 8192  ;;  %p2638_p2 = scmp.lt.s32.totalorder %s2823_s25, %s2823_s25 }
  0x1e   : > { %p2631_p9 = scmp.ne.s32.totalorder %s2823_s25, %s2630_s11  ;;  %p2639_p6 = scmp.lt.s32.totalorder %s2630_s11, %s2630_s11 }
  0x20   : > { %p2633_p10 = pnand %p2631_p9, %p2619_p13  ;;  %p2640_p4 = por %p2639_p6, %p2638_p2 }
  0x22   : > { %p2634_p1 = pneg %p2633_p10 }
  0x24   : > { %p2641_p8 = pnand %p2640_p4, %p2634_p1 }
  0x26   : > { %2644 = shalt.err (!%p2641_p8)
}
  0x27   : > { %s2748_s12 = smov 128   ;;  %s2749_s13 = smov 8  }
  0x28   : > { %2395 = dma.hbm_to_vmem [thread:$0]  (!%p2830_p11), %s3769_s3, 8192, %s2823_s25, [#allocation6], %s2748_s12, %s2748_s12, %s2749_s13  }
  0x29   : > { %p26_p2 = scmp.eq.s32.totalorder %s25_s29, 0  ;;  %p35_p1 = scmp.ne.s32.totalorder %s2741_s17, %s2737_s16 }
  0x2a   : > { %p36_p4 = scmp.eq.s32.totalorder %s2745_s18, 0  ;;  %p2405_p6 = scmp.lt.s32.totalorder %s2745_s18, 2 }
  0x2b   : > { %s2866_s24 = scalar_select %p26_p2, %s2741_s17, %s28_s28  }
  0x2c   : > { %p37_p8 = por %p36_p4, %p35_p1  ;;  %p3778_p10 = scmp.eq.s32.totalorder %s2800_s19, 1 }
  0x2d   : > { %s173_s5 = sand.u32 1, %s2741_s17   ;;  %s2347_s6 = sshll.u32 %s2745_s18, 13 }
  0x2e   : > { %p2870_p12 = por %p3778_p10, %p35_p1  ;;  %s2263_s7 = sshll.u32 %s173_s5, 9 }
  0x2f   : > { %s2879_s9 = scalar_lea.hbm %s3766_s0, %s2347_s6  ;;  %s177_s25 = scalar_lea.vmem [#allocation2], %s2263_s7 }
  0x30   : > { %s184_s28 = sshll.u32 %s177_s25, 4  ;;  %p2881_p11 = pnand %p2405_p6, %p37_p8  ;;  %s2885_s28 = int_to_ptr.vmem [resolvable:$true] %s184_s28 }
  0x31   : > { %s2887_s10 = scalar_lea.sflag [#allocation3], %s173_s5  ;;  %s2645_s11 = scalar_lea.hbm %s2879_s9, 8192 }
  0x32   : > { %p2646_p13 = scmp.ne.s32.totalorder %s2879_s9, %s2645_s11  ;;  %p2647_p0 = pneg %p2881_p11 }
  0x33   : > { %s2650_s14 = scalar_lea.hbm %s3766_s0, 16384  ;;  %p2651_p7 = scmp.lt.u32.totalorder %s2879_s9, %s3766_s0 }
  0x34   : > { %p2648_p3 = pnand %p2647_p0, %p2646_p13  ;;  %p2652_p9 = scmp.lt.u32.totalorder %s2650_s14, %s2645_s11 }
  0x35   : > { %p2654_p1 = scmp.lt.u32.totalorder %s2645_s11, %s2879_s9 }
  0x36   : > { %p2649_p5 = pneg %p2648_p3  ;;  %p2653_p2 = por %p2652_p9, %p2651_p7 }
  0x38   : > { %p2655_p4 = por %p2654_p1, %p2653_p2 }
  0x3a   : > { %p2656_p6 = pnand %p2655_p4, %p2649_p5 }
  0x3c   : > { %2659 = shalt.err (!%p2656_p6)
}
  0x3d   : > { %s2660_s5 = scalar_lea.vmem %s2885_s28, 8192  ;;  %s2750_s7 = smov [#allocation2]  }
  0x3e   : > { %p2661_p8 = scmp.ne.s32.totalorder %s2885_s28, %s2660_s5  ;;  %s2665_s26 = sshll.u32 %s2750_s7, 4  ;;  %s2666_s26 = int_to_ptr.vmem [resolvable:$false] %s2665_s26 }
  0x3f   : > { %s2667_s8 = scalar_lea.vmem %s2666_s26, 16384  ;;  %p2668_p3 = scmp.lt.s32.totalorder %s2885_s28, %s2666_s26 }
  0x40   : > { %p2663_p10 = pnand %p2661_p8, %p2647_p0  ;;  %p2669_p7 = scmp.lt.s32.totalorder %s2667_s8, %s2660_s5 }
  0x42   : > { %p2664_p13 = pneg %p2663_p10  ;;  %p2670_p9 = por %p2669_p7, %p2668_p3 }
  0x44   : > { %p2671_p2 = pnand %p2670_p9, %p2664_p13 }
  0x46   : > { %2674 = shalt.err (!%p2671_p2)
}
  0x47   : > { %s2751_s25 = smov 256   ;;  %s2752_s11 = smov 16  }
  0x48   : > { %2399 = dma.hbm_to_vmem [thread:$0]  (!%p2881_p11), %s2879_s9, 8192, %s2885_s28, %s2887_s10, %s2751_s25, %s2751_s25, %s2752_s11  }
  0x49   : > { %p3781_p0 = scmp.ne.s32.totalorder %s3776_s23, 0 }
  0x4a   : > { %s2918_s12 = sand.u32 (!%p3781_p0), 1, %s2737_s16   ;;  %p3782_p5 = scmp.ne.s32.totalorder (!%p3781_p0), %s3774_s21, 0 }
  0x4b   : > { %196 = sbr.rel (%p3781_p0) target bundleno = 1305 (0x519), region = 36  ;;  %s2267_s13 = sshll.u32 (!%p3781_p0), %s2918_s12, 9 }
  0x4c   : > { %s199_s14 = scalar_lea.sflag (!%p3781_p0), [#allocation3], %s2918_s12  ;;  %s2922_s20 = scalar_lea.vmem (!%p3781_p0), [#allocation2], %s2267_s13 }
  0x52   : > { %2720 = dma.done.wait (%p3782_p5), %s199_s14, 8192  }
  0x53   : > { %2722 = vsyncadd (%p3782_p5), %s199_s14, 4294959104  ;;  %p3783_p11 = scmp.eq.s32.totalorder %s2800_s19, 0 }
  0x55   : > { %2724 = dma.done.wait (%p3783_p11), [#allocation6], 8192   ;;  %p3784_p1 = pmov %p3783_p11 }
  0x56   : > { %v2933_v0 = vld [vmem:[%s2922_s20 + $0x40] sm:$0xff]  ;;  %v2936_v1 = vld [vmem:[%s2922_s20 + $0x48] sm:$0xff]  ;;  %v2947_v5 = vld [vmem:[%s2922_s20 + $0x50] sm:$0xff]  ;;  %vm562_vm0 = vcmask 130112   ;;  %vm569_vm1 = vcmask 195712   ;;  %vm576_vm2 = vcmask 261312  }
  0x57   : > { %2726 = vsyncadd (%p3784_p1), [#allocation6], 4294959104  ;;  %v2939_v2 = vld [vmem:[%s2922_s20] sm:$0xff]  ;;  %v307_v3 = vadd.f32 %v2936_v1, %v2933_v0  ;;  %v2944_v4 = vld [vmem:[%s2922_s20 + $0x8] sm:$0xff]  ;;  %v435_v54 = vmax.f32 %v2933_v0, %v2936_v1  ;;  %vm711_vm3 = vcmask 1041409   ;;  %vm713_vm4 = vcmask 1042434  }
  0x58   : > { %v2950_v6 = vld [vmem:[%s2922_s20 + $0x58] sm:$0xff]  ;;  %v295_v7 = vadd.f32 %v2944_v4, %v2939_v2  ;;  %v2955_v8 = vld [vmem:[%s2922_s20 + $0x10] sm:$0xff]  ;;  %v2965_v12 = vld [vmem:[%s2922_s20 + $0x60] sm:$0xff]  ;;  %v423_v50 = vmax.f32 %v2939_v2, %v2944_v4  ;;  %vm715_vm5 = vcmask 1043459   ;;  %vm717_vm6 = vcmask 1044484   ;;  %s2269_s8 = sshll.u32 %s2918_s12, 4 }
  0x59   : > { %v2958_v9 = vld [vmem:[%s2922_s20 + $0x18] sm:$0xff]  ;;  %308 = vadd.xlane.f32.xlu1 %v307_v3  ;;  %v310_v10 = vadd.f32 %v2950_v6, %v2947_v5  ;;  %v2968_v13 = vld [vmem:[%s2922_s20 + $0x68] sm:$0xff]  ;;  %v2971_v14 = vld [vmem:[%s2922_s20 + $0x20] sm:$0xff]  ;;  %v438_v61 = vmax.f32 %v2947_v5, %v2950_v6  ;;  %vm719_vm7 = vcmask 1045509   ;;  %vm721_vm8 = vcmask 1046534   ;;  %s2348_s25 = sshll.u32 %s2800_s19, 8 }
  0x5a   : > { %296 = vadd.xlane.f32.xlu0 %v295_v7  ;;  %v298_v11 = vadd.f32 %v2958_v9, %v2955_v8  ;;  %v2974_v15 = vld [vmem:[%s2922_s20 + $0x28] sm:$0xff]  ;;  %v313_v16 = vadd.f32 %v2968_v13, %v2965_v12  ;;  %v2981_v18 = vld [vmem:[%s2922_s20 + $0x90] sm:$0xff]  ;;  %v2984_v19 = vld [vmem:[%s2922_s20 + $0x98] sm:$0xff]  ;;  %v426_v55 = vmax.f32 %v2955_v8, %v2958_v9  ;;  %v441_v5 = vmax.f32 %v2965_v12, %v2968_v13  ;;  %s230_s11 = scalar_lea.vmem [#allocation7], %s2269_s8  ;;  %s3722_s21 = scalar_lea.hbm %s3770_s4, %s2348_s25 }
  0x5b   : > { %v301_v17 = vadd.f32 %v2974_v15, %v2971_v14  ;;  %v2987_v20 = vld [vmem:[%s2922_s20 + $0x80] sm:$0xff]  ;;  %v2990_v21 = vld [vmem:[%s2922_s20 + $0x88] sm:$0xff]  ;;  %v322_v22 = vadd.f32 %v2984_v19, %v2981_v18  ;;  %v2997_v24 = vld [vmem:[%s2922_s20 + $0x70] sm:$0xff]  ;;  %v429_v2 = vmax.f32 %v2971_v14, %v2974_v15  ;;  %v450_v9 = vmax.f32 %v2981_v18, %v2984_v19  ;;  %s2179_s13 = sshll.u32 %s230_s11, 4  ;;  %s2165_s23 = scalar_lea.sflag [#allocation4], %s2918_s12  ;;  %s3724_s13 = int_to_ptr.vmem [resolvable:$true] %s2179_s13 }
  0x5c   : > { %v319_v23 = vadd.f32 %v2990_v21, %v2987_v20  ;;  %v3000_v25 = vld [vmem:[%s2922_s20 + $0x78] sm:$0xff]  ;;  %v3003_v26 = vld [vmem:[%s2922_s20 + $0x30] sm:$0xff]  ;;  %v3013_v30 = vld [vmem:[%s2922_s20 + $0xc0] sm:$0xff]  ;;  %v447_v4 = vmax.f32 %v2987_v20, %v2990_v21  ;;  %vm723_vm9 = vcmask 1047559   ;;  %vm920_vm10 = vcmask 261120   ;;  %s2675_s9 = scalar_lea.vmem %s3724_s13, 256 }
  0x5d   : > { %311 = vadd.xlane.f32.xlu1 %v310_v10  ;;  %v3006_v27 = vld [vmem:[%s2922_s20 + $0x38] sm:$0xff]  ;;  %v316_v28 = vadd.f32 %v3000_v25, %v2997_v24  ;;  %v3016_v31 = vld [vmem:[%s2922_s20 + $0xc8] sm:$0xff]  ;;  %v3019_v32 = vld [vmem:[%s2922_s20 + $0xa0] sm:$0xff]  ;;  %v444_v21 = vmax.f32 %v2997_v24, %v3000_v25  ;;  %vm1010_vm11 = vcmask 1041408   ;;  %vm1003_vm12 = vcmask 15360   ;;  %p2676_p4 = scmp.ne.s32.totalorder %s3724_s13, %s2675_s9  ;;  %s2753_s19 = smov [#allocation7]  }
  0x5e   : > { %299 = vadd.xlane.f32.xlu0 %v298_v11  ;;  %v304_v29 = vadd.f32 %v3006_v27, %v3003_v26  ;;  %v3022_v33 = vld [vmem:[%s2922_s20 + $0xa8] sm:$0xff]  ;;  %v331_v34 = vadd.f32 %v3016_v31, %v3013_v30  ;;  %v3029_v36 = vld [vmem:[%s2922_s20 + $0xb0] sm:$0xff]  ;;  %v3032_v37 = vld [vmem:[%s2922_s20 + $0xb8] sm:$0xff]  ;;  %v432_v18 = vmax.f32 %v3003_v26, %v3006_v27  ;;  %s2679_s28 = sshll.u32 %s2753_s19, 4  ;;  %s2680_s28 = int_to_ptr.vmem [resolvable:$false] %s2679_s28 }
  0x5f   : > { %v325_v35 = vadd.f32 %v3022_v33, %v3019_v32  ;;  %v3035_v38 = vld [vmem:[%s2922_s20 + $0xd0] sm:$0xff]  ;;  %v3038_v39 = vld [vmem:[%s2922_s20 + $0xd8] sm:$0xff]  ;;  %v3041_v40 = vld [vmem:[%s2922_s20 + $0x100] sm:$0xff]  ;;  %v328_v42 = vadd.f32 %v3032_v37, %v3029_v36  ;;  %v453_v20 = vmax.f32 %v3019_v32, %v3022_v33  ;;  %p2677_p6 = pnand %p2676_p4, %p2870_p12  ;;  %s2681_s29 = scalar_lea.vmem %s2680_s28, 512 }
  0x60   : > { %v3044_v41 = vld [vmem:[%s2922_s20 + $0x108] sm:$0xff]  ;;  %v3049_v43 = vld [vmem:[%s2922_s20 + $0xe0] sm:$0xff]  ;;  %v334_v45 = vadd.f32 %v3038_v39, %v3035_v38  ;;  %v3059_v47 = vld [vmem:[%s2922_s20 + $0x110] sm:$0xff]  ;;  %p2682_p10 = scmp.lt.s32.totalorder %s3724_s13, %s2680_s28  ;;  %p2683_p13 = scmp.lt.s32.totalorder %s2681_s29, %s2675_s9 }
  0x61   : > { %314 = vadd.xlane.f32.xlu1 %v313_v16  ;;  %v3052_v44 = vld [vmem:[%s2922_s20 + $0xe8] sm:$0xff]  ;;  %v343_v46 = vadd.f32 %v3044_v41, %v3041_v40  ;;  %v3062_v48 = vld [vmem:[%s2922_s20 + $0x118] sm:$0xff]  ;;  %v3071_v52 = vld [vmem:[%s2922_s20 + $0xf0] sm:$0xff]  ;;  %p2678_p8 = pneg %p2677_p6 }
  0x62   : > { %302 = vadd.xlane.f32.xlu0 %v301_v17  ;;  %v337_v49 = vadd.f32 %v3052_v44, %v3049_v43  ;;  %v346_v51 = vadd.f32 %v3062_v48, %v3059_v47  ;;  %v3074_v53 = vld [vmem:[%s2922_s20 + $0xf8] sm:$0xff]  ;;  %v3081_v56 = vld [vmem:[%s2922_s20 + $0x140] sm:$0xff]  ;;  %v3084_v57 = vld [vmem:[%s2922_s20 + $0x148] sm:$0xff]  ;;  %p2684_p3 = por %p2683_p13, %p2682_p10 }
  0x63   : > { %v340_v58 = vadd.f32 %v3074_v53, %v3071_v52  ;;  %v3089_v59 = vld [vmem:[%s2922_s20 + $0x120] sm:$0xff]  ;;  %v3092_v60 = vld [vmem:[%s2922_s20 + $0x128] sm:$0xff]  ;;  %v355_v62 = vadd.f32 %v3084_v57, %v3081_v56  ;;  %v3101_v0 = vld [vmem:[%s2922_s20 + $0x150] sm:$0xff] }
  0x64   : > { %v349_v63 = vadd.f32 %v3092_v60, %v3089_v59  ;;  %v3104_v1 = vld [vmem:[%s2922_s20 + $0x158] sm:$0xff]  ;;  %v3115_v6 = vld [vmem:[%s2922_s20 + $0x130] sm:$0xff]  ;;  %v3125_v10 = vld [vmem:[%s2922_s20 + $0x180] sm:$0xff]  ;;  %p2685_p7 = pnand %p2684_p3, %p2678_p8 }
  0x65   : > { %323 = vadd.xlane.f32.xlu1 %v322_v22  ;;  %v358_v3 = vadd.f32 %v3104_v1, %v3101_v0  ;;  %v3118_v7 = vld [vmem:[%s2922_s20 + $0x138] sm:$0xff]  ;;  %v3128_v11 = vld [vmem:[%s2922_s20 + $0x188] sm:$0xff]  ;;  %v3131_v14 = vld [vmem:[%s2922_s20 + $0x160] sm:$0xff]  ;;  %v462_v22 = vmax.f32 %v3035_v38, %v3038_v39  ;;  %v456_v39 = vmax.f32 %v3029_v36, %v3032_v37  ;;  %v477_v36 = vmax.f32 %v3089_v59, %v3092_v60 }
  0x66   : > { %320 = vadd.xlane.f32.xlu0 %v319_v23  ;;  %v352_v8 = vadd.f32 %v3118_v7, %v3115_v6  ;;  %v3134_v12 = vld [vmem:[%s2922_s20 + $0x168] sm:$0xff]  ;;  %v367_v13 = vadd.f32 %v3128_v11, %v3125_v10  ;;  %v3141_v16 = vld [vmem:[%s2922_s20 + $0x190] sm:$0xff]  ;;  %v3144_v17 = vld [vmem:[%s2922_s20 + $0x198] sm:$0xff]  ;;  %v459_v23 = vmax.f32 %v3013_v30, %v3016_v31  ;;  %v465_v31 = vmax.f32 %v3049_v43, %v3052_v44 }
  0x67   : > { %v361_v15 = vadd.f32 %v3134_v12, %v3131_v14  ;;  %v370_v19 = vadd.f32 %v3144_v17, %v3141_v16  ;;  %v283_v26 = vld [vmem:[%s2922_s20 + $0x1a0] sm:$0xff]  ;;  %v284_v27 = vld [vmem:[%s2922_s20 + $0x1a8] sm:$0xff]  ;;  %v290_v24 = vld [vmem:[%s2922_s20 + $0x1d8] sm:$0xff]  ;;  %v468_v37 = vmax.f32 %v3071_v52, %v3074_v53  ;;  %v495_v52 = vmax.f32 %v3125_v10, %v3128_v11 }
  0x68   : > { %v373_v32 = vadd.f32 %v284_v27, %v283_v26  ;;  %v287_v25 = vld [vmem:[%s2922_s20 + $0x1c0] sm:$0xff]  ;;  %v489_v53 = vmax.f32 %v3131_v14, %v3134_v12  ;;  %v501_v59 = vmax.f32 %v283_v26, %v284_v27 }
  0x69   : > { %317 = vadd.xlane.f32.xlu1 %v316_v28  ;;  %v277_v28 = vld [vmem:[%s2922_s20 + $0x170] sm:$0xff] }
  0x6a   : > { %305 = vadd.xlane.f32.xlu0 %v304_v29  ;;  %v278_v29 = vld [vmem:[%s2922_s20 + $0x178] sm:$0xff] }
  0x6b   : > { %v364_v33 = vadd.f32 %v278_v29, %v277_v28 }
  0x6d   : > { %332 = vadd.xlane.f32.xlu1 %v331_v34  ;;  %v289_v34 = vld [vmem:[%s2922_s20 + $0x1d0] sm:$0xff] }
  0x6e   : > { %326 = vadd.xlane.f32.xlu0 %v325_v35  ;;  %v288_v35 = vld [vmem:[%s2922_s20 + $0x1c8] sm:$0xff]  ;;  %v382_v38 = vadd.f32 %v290_v24, %v289_v34 }
  0x6f   : > { %v379_v30 = vadd.f32 %v288_v35, %v287_v25 }
  0x71   : > { %329 = vadd.xlane.f32.xlu1 %v328_v42  ;;  %v474_v42 = vmax.f32 %v3059_v47, %v3062_v48  ;;  %v293_v47 = vld [vmem:[%s2922_s20 + $0x1f0] sm:$0xff]  ;;  %v294_v48 = vld [vmem:[%s2922_s20 + $0x1f8] sm:$0xff] }
  0x72   : > { %335 = vadd.xlane.f32.xlu0 %v334_v45  ;;  %v471_v45 = vmax.f32 %v3041_v40, %v3044_v41  ;;  %v486_v40 = vmax.f32 %v3101_v0, %v3104_v1  ;;  %v483_v41 = vmax.f32 %v3081_v56, %v3084_v57  ;;  %v498_v56 = vmax.f32 %v3141_v16, %v3144_v17  ;;  %v916_v0 = vld [vmem:[%s3767_s1] sm:$0xff]  ;;  %v917_v1 = vld [vmem:[%s3767_s1 + $0x8] sm:$0xff] }
  0x73   : > { %v507_v57 = vmax.f32 %v287_v25, %v288_v35 }
  0x75   : > { %344 = vadd.xlane.f32.xlu1 %v343_v46  ;;  %v291_v46 = vld [vmem:[%s2922_s20 + $0x1e0] sm:$0xff] }
  0x76   : > { %338 = vadd.xlane.f32.xlu0 %v337_v49  ;;  %v292_v49 = vld [vmem:[%s2922_s20 + $0x1e8] sm:$0xff] }
  0x77   : > { %v385_v43 = vadd.f32 %v292_v49, %v291_v46 }
  0x79   : > { %424 = vmax.xlane.f32.xlu1 %v423_v50  ;;  %v285_v50 = vld [vmem:[%s2922_s20 + $0x1b0] sm:$0xff] }
  0x7a   : > { %347 = vadd.xlane.f32.xlu0 %v346_v51  ;;  %v286_v51 = vld [vmem:[%s2922_s20 + $0x1b8] sm:$0xff] }
  0x7b   : > { %v376_v44 = vadd.f32 %v286_v51, %v285_v50  ;;  %v504_v60 = vmax.f32 %v285_v50, %v286_v51 }
  0x7d   : > { %436 = vmax.xlane.f32.xlu1 %v435_v54  ;;  %v480_v54 = vmax.f32 %v3115_v6, %v3118_v7 }
  0x7e   : > { %427 = vmax.xlane.f32.xlu0 %v426_v55  ;;  %v388_v55 = vadd.f32 %v294_v48, %v293_v47 }
  0x81   : > { %341 = vadd.xlane.f32.xlu1 %v340_v58  ;;  %v492_v58 = vmax.f32 %v277_v28, %v278_v29 }
  0x82   : > { %439 = vmax.xlane.f32.xlu0 %v438_v61  ;;  %v510_v61 = vmax.f32 %v289_v34, %v290_v24 }
  0x85   : > { %356 = vadd.xlane.f32.xlu1 %v355_v62  ;;  %v516_v62 = vmax.f32 %v293_v47, %v294_v48 }
  0x86   : > { %350 = vadd.xlane.f32.xlu0 %v349_v63  ;;  %v513_v63 = vmax.f32 %v291_v46, %v292_v49 }
  0x89   : > { %430 = vmax.xlane.f32.xlu1 %v429_v2  ;;  %v551_v2 = vlaneseq }
  0x8a   : > { %359 = vadd.xlane.f32.xlu0 %v358_v3  ;;  %v2374_v3 = vpack.c.bf16 %v917_v1, %v916_v0 }
  0x8b   : > { %v552_v6 = vand.u32 127, %v551_v2 }
  0x8c   : > { %2375 = vmatprep.subr.bf16.mxu0 %v2374_v3 }
  0x8d   : > { %448 = vmax.xlane.f32.xlu1 %v447_v4  ;;  %2377 = vmatpush3.bf16.msra.mxu0 %v2374_v3  ;;  %v918_v4 = vld [vmem:[%s3767_s1 + $0x10] sm:$0xff]  ;;  %v571_v35 = vadd.s32 4294967272, %v552_v6 }
  0x8e   : > { %442 = vmax.xlane.f32.xlu0 %v441_v5  ;;  %v919_v5 = vld [vmem:[%s3767_s1 + $0x18] sm:$0xff] }
  0x8f   : > { %v2378_v7 = vpack.c.bf16 %v919_v5, %v918_v4 }
  0x91   : > { %353 = vadd.xlane.f32.xlu1 %v352_v8  ;;  %v3208_v8 = vshrl.u32 %v551_v2, 7  ;;  %2379 = vmatprep.subr.bf16.mxu0 %v2378_v7 }
  0x92   : > { %451 = vmax.xlane.f32.xlu0 %v450_v9  ;;  %v557_v9 = vadd.s32 4294967288, %v552_v6  ;;  %2381 = vmatpush3.bf16.msra.mxu0 %v2378_v7 }
  0x93   : > { %v3211_v14 = vsub.s32 %v552_v6, %v3208_v8  ;;  %v3231_v50 = vsub.s32 %v571_v35, %v3208_v8 }
  0x95   : > { %368 = vadd.xlane.f32.xlu1 %v367_v13  ;;  %v3214_v13 = vsub.s32 %v557_v9, %v3208_v8 }
  0x96   : > { %362 = vadd.xlane.f32.xlu0 %v361_v15  ;;  %v564_v15 = vadd.s32 4294967280, %v552_v6 }
  0x99   : > { %433 = vmax.xlane.f32.xlu1 %v432_v18 }
  0x9a   : > { %371 = vadd.xlane.f32.xlu0 %v370_v19 }
  0x9d   : > { %454 = vmax.xlane.f32.xlu1 %v453_v20 }
  0x9e   : > { %445 = vmax.xlane.f32.xlu0 %v444_v21 }
  0xa1   : > { %463 = vmax.xlane.f32.xlu1 %v462_v22 }
  0xa2   : > { %460 = vmax.xlane.f32.xlu0 %v459_v23  ;;  %v3219_v23 = vsub.s32 %v564_v15, %v3208_v8 }
  0xa5   : > { %374 = vadd.xlane.f32.xlu1 %v373_v32 }
  0xa6   : > { %365 = vadd.xlane.f32.xlu0 %v364_v33 }
  0xa9   : > { %383 = vadd.xlane.f32.xlu1 %v382_v38 }
  0xaa   : > { %380 = vadd.xlane.f32.xlu0 %v379_v30 }
  0xad   : > { %466 = vmax.xlane.f32.xlu1 %v465_v31 }
  0xae   : > { %457 = vmax.xlane.f32.xlu0 %v456_v39 }
  0xb1   : > { %475 = vmax.xlane.f32.xlu1 %v474_v42 }
  0xb2   : > { %472 = vmax.xlane.f32.xlu0 %v471_v45 }
  0xb5   : > { %386 = vadd.xlane.f32.xlu1 %v385_v43 }
  0xb6   : > { %377 = vadd.xlane.f32.xlu0 %v376_v44 }
  0xb9   : > { %478 = vmax.xlane.f32.xlu1 %v477_v36 }
  0xba   : > { %469 = vmax.xlane.f32.xlu0 %v468_v37 }
  0xbd   : > { %487 = vmax.xlane.f32.xlu1 %v486_v40 }
  0xbe   : > { %484 = vmax.xlane.f32.xlu0 %v483_v41 }
  0xc1   : > { %481 = vmax.xlane.f32.xlu1 %v480_v54 }
  0xc2   : > { %389 = vadd.xlane.f32.xlu0 %v388_v55 }
  0xc5   : > { %496 = vmax.xlane.f32.xlu1 %v495_v52 }
  0xc6   : > { %490 = vmax.xlane.f32.xlu0 %v489_v53 }
  0xc9   : > { %493 = vmax.xlane.f32.xlu1 %v492_v58 }
  0xca   : > { %499 = vmax.xlane.f32.xlu0 %v498_v56 }
  0xcd   : > { %508 = vmax.xlane.f32.xlu1 %v507_v57 }
  0xce   : > { %502 = vmax.xlane.f32.xlu0 %v501_v59 }
  0xd1   : > { %505 = vmax.xlane.f32.xlu1 %v504_v60 }
  0xd2   : > { %511 = vmax.xlane.f32.xlu0 %v510_v61 }
  0xd5   : > { %517 = vmax.xlane.f32.xlu1 %v516_v62 }
  0xd6   : > { %514 = vmax.xlane.f32.xlu0 %v513_v63 }
  0xe6   : > { %v309_v10 = vpop.xlane.xlu1 %308 }
  0xe7   : > { %v297_v11 = vpop.xlane.xlu0 %296  ;;  %v395_v12 = vmul.f32 0.00390625, %v309_v10 }
  0xe8   : > { %v391_v16 = vmul.f32 0.00390625, %v297_v11 }
  0xe9   : > { %v581_v21 = vrot.slane %v395_v12, %v3211_v14 }
  0xea   : > { %v312_v17 = vpop.xlane.xlu1 %311  ;;  %v556_v26 = vrot.slane %v391_v16, %v3211_v14 }
  0xeb   : > { %v396_v18 = vmul.f32 0.00390625, %v312_v17  ;;  %v300_v19 = vpop.xlane.xlu0 %299 }
  0xec   : > { %v392_v20 = vmul.f32 0.00390625, %v300_v19 }
  0xed   : > { %v585_v22 = vrot.slane %v396_v18, %v3214_v13 }
  0xee   : > { %v561_v27 = vrot.slane %v392_v20, %v3214_v13  ;;  %v315_v28 = vpop.xlane.xlu1 %314 }
  0xef   : > { %v586_v29 = vsel %vm562_vm0, %v585_v22, %v581_v21  ;;  %v397_v32 = vmul.f32 0.00390625, %v315_v28  ;;  %v303_v33 = vpop.xlane.xlu0 %302 }
  0xf0   : > { %v563_v34 = vsel %vm562_vm0, %v561_v27, %v556_v26  ;;  %v393_v24 = vmul.f32 0.00390625, %v303_v33 }
  0xf1   : > { %v590_v25 = vrot.slane %v397_v32, %v3219_v23 }
  0xf2   : > { %v568_v38 = vrot.slane %v393_v24, %v3219_v23  ;;  %v324_v30 = vpop.xlane.xlu1 %323 }
  0xf3   : > { %v591_v31 = vsel %vm569_vm1, %v590_v25, %v586_v29  ;;  %v400_v39 = vmul.f32 0.00390625, %v324_v30  ;;  %v321_v42 = vpop.xlane.xlu0 %320 }
  0xf4   : > { %v570_v45 = vsel %vm569_vm1, %v568_v38, %v563_v34  ;;  %v399_v46 = vmul.f32 0.00390625, %v321_v42 }
  0xf5   : > { %v604_v49 = vrot.slane %v400_v39, %v3214_v13 }
  0xf6   : > { %v600_v51 = vrot.slane %v399_v46, %v3211_v14  ;;  %v318_v43 = vpop.xlane.xlu1 %317 }
  0xf7   : > { %v398_v44 = vmul.f32 0.00390625, %v318_v43  ;;  %v306_v36 = vpop.xlane.xlu0 %305 }
  0xf8   : > { %v605_v37 = vsel %vm562_vm0, %v604_v49, %v600_v51  ;;  %v394_v40 = vmul.f32 0.00390625, %v306_v36 }
  0xf9   : > { %v595_v41 = vrot.slane %v398_v44, %v3231_v50 }
  0xfa   : > { %v575_v47 = vrot.slane %v394_v40, %v3231_v50  ;;  %v333_v48 = vpop.xlane.xlu1 %332 }
  0xfb   : > { %v596_v54 = vsel %vm576_vm2, %v595_v41, %v591_v31  ;;  %v327_v55 = vpop.xlane.xlu0 %326  ;;  %v403_v56 = vmul.f32 0.00390625, %v333_v48 }
  0xfc   : > { %v577_v52 = vsel %vm576_vm2, %v575_v47, %v570_v45  ;;  %v401_v53 = vmul.f32 0.00390625, %v327_v55 }
  0xfd   : > { %v712_v58 = vsel %vm711_vm3, %v596_v54, %v577_v52  ;;  %v619_v1 = vrot.slane %v403_v56, %v3211_v14 }
  0xfe   : > { %v609_v57 = vrot.slane %v401_v53, %v3219_v23  ;;  %v330_v59 = vpop.xlane.xlu1 %329 }
  0xff   : > { %v402_v60 = vmul.f32 0.00390625, %v330_v59  ;;  %v336_v61 = vpop.xlane.xlu0 %335 }
 0x100   : > { %v610_v62 = vsel %vm569_vm1, %v609_v57, %v605_v37  ;;  %v404_v63 = vmul.f32 0.00390625, %v336_v61 }
 0x101   : > { %v614_v0 = vrot.slane %v402_v60, %v3231_v50 }
 0x102   : > { %v623_v2 = vrot.slane %v404_v63, %v3214_v13  ;;  %v345_v3 = vpop.xlane.xlu1 %344 }
 0x103   : > { %v615_v4 = vsel %vm576_vm2, %v614_v0, %v610_v62  ;;  %v339_v5 = vpop.xlane.xlu0 %338  ;;  %v407_v10 = vmul.f32 0.00390625, %v345_v3 }
 0x104   : > { %v714_v6 = vsel %vm713_vm4, %v615_v4, %v712_v58  ;;  %v624_v7 = vsel %vm562_vm0, %v623_v2, %v619_v1  ;;  %v405_v9 = vmul.f32 0.00390625, %v339_v5 }
 0x105   : > { %v638_v18 = vrot.slane %v407_v10, %v3211_v14 }
 0x106   : > { %v628_v11 = vrot.slane %v405_v9, %v3219_v23  ;;  %v425_v12 = vpop.xlane.xlu1 %424 }
 0x107   : > { %v348_v15 = vpop.xlane.xlu0 %347  ;;  %v760_v22 = vrot.slane %v425_v12, %v3211_v14 }
 0x108   : > { %v629_v16 = vsel %vm569_vm1, %v628_v11, %v624_v7  ;;  %v408_v17 = vmul.f32 0.00390625, %v348_v15 }
 0x10a   : > { %v642_v19 = vrot.slane %v408_v17, %v3214_v13  ;;  %v437_v20 = vpop.xlane.xlu1 %436 }
 0x10b   : > { %v428_v21 = vpop.xlane.xlu0 %427  ;;  %v779_v34 = vrot.slane %v437_v20, %v3211_v14 }
 0x10c   : > { %v643_v26 = vsel %vm562_vm0, %v642_v19, %v638_v18  ;;  %v764_v27 = vrot.slane %v428_v21, %v3214_v13 }
 0x10e   : > { %v765_v28 = vsel %vm562_vm0, %v764_v27, %v760_v22  ;;  %v342_v29 = vpop.xlane.xlu1 %341 }
 0x10f   : > { %v406_v32 = vmul.f32 0.00390625, %v342_v29  ;;  %v440_v33 = vpop.xlane.xlu0 %439 }
 0x110   : > { %v783_v24 = vrot.slane %v440_v33, %v3214_v13 }
 0x111   : > { %v633_v25 = vrot.slane %v406_v32, %v3231_v50 }
 0x112   : > { %v784_v35 = vsel %vm562_vm0, %v783_v24, %v779_v34  ;;  %v357_v38 = vpop.xlane.xlu1 %356 }
 0x113   : > { %v634_v30 = vsel %vm576_vm2, %v633_v25, %v629_v16  ;;  %v351_v31 = vpop.xlane.xlu0 %350  ;;  %v411_v25 = vmul.f32 0.00390625, %v357_v38 }
 0x114   : > { %v716_v39 = vsel %vm715_vm5, %v634_v30, %v714_v6  ;;  %v409_v51 = vmul.f32 0.00390625, %v351_v31 }
 0x116   : > { %v431_v42 = vpop.xlane.xlu1 %430  ;;  %v647_v37 = vrot.slane %v409_v51, %v3219_v23 }
 0x117   : > { %v769_v45 = vrot.slane %v431_v42, %v3219_v23  ;;  %v360_v46 = vpop.xlane.xlu0 %359 }
 0x118   : > { %v648_v55 = vsel %vm569_vm1, %v647_v37, %v643_v26  ;;  %v412_v29 = vmul.f32 0.00390625, %v360_v46  ;;  %v657_v37 = vrot.slane %v411_v25, %v3211_v14 }
 0x119   : > { %v770_v49 = vsel %vm569_vm1, %v769_v45, %v765_v28 }
 0x11a   : > { %v449_v43 = vpop.xlane.xlu1 %448  ;;  %v661_v42 = vrot.slane %v412_v29, %v3214_v13 }
 0x11b   : > { %v443_v44 = vpop.xlane.xlu0 %442  ;;  %v798_v12 = vrot.slane %v449_v43, %v3211_v14 }
 0x11c   : > { %v788_v36 = vrot.slane %v443_v44, %v3219_v23 }
 0x11e   : > { %v789_v40 = vsel %vm569_vm1, %v788_v36, %v784_v35  ;;  %v354_v41 = vpop.xlane.xlu1 %353 }
 0x11f   : > { %v410_v47 = vmul.f32 0.00390625, %v354_v41  ;;  %v452_v48 = vpop.xlane.xlu0 %451 }
 0x120   : > { %v802_v10 = vrot.slane %v452_v48, %v3214_v13  ;;  %v662_v48 = vsel %vm562_vm0, %v661_v42, %v657_v37 }
 0x121   : > { %v652_v54 = vrot.slane %v410_v47, %v3231_v50 }
 0x122   : > { %v369_v52 = vpop.xlane.xlu1 %368  ;;  %v803_v17 = vsel %vm562_vm0, %v802_v10, %v798_v12 }
 0x123   : > { %v653_v53 = vsel %vm576_vm2, %v652_v54, %v648_v55  ;;  %v363_v58 = vpop.xlane.xlu0 %362  ;;  %v415_v31 = vmul.f32 0.00390625, %v369_v52 }
 0x124   : > { %v3271_v56 = vsel %vm717_vm6, %v653_v53, %v716_v39  ;;  %v413_v33 = vmul.f32 0.00390625, %v363_v58 }
 0x125   : > { %v676_v41 = vrot.slane %v415_v31, %v3211_v14 }
 0x126   : > { %v434_v57 = vpop.xlane.xlu1 %433  ;;  %v666_v43 = vrot.slane %v413_v33, %v3219_v23 }
 0x127   : > { %v372_v59 = vpop.xlane.xlu0 %371  ;;  %v774_v60 = vrot.slane %v434_v57, %v3231_v50 }
 0x128   : > { %v416_v34 = vmul.f32 0.00390625, %v372_v59  ;;  %v667_v53 = vsel %vm569_vm1, %v666_v43, %v662_v48 }
 0x129   : > { %v775_v0 = vsel %vm576_vm2, %v774_v60, %v770_v49 }
 0x12a   : > { %v455_v61 = vpop.xlane.xlu1 %454  ;;  %v680_v46 = vrot.slane %v416_v34, %v3214_v13 }
 0x12b   : > { %v446_v62 = vpop.xlane.xlu0 %445  ;;  %v807_v11 = vrot.slane %v455_v61, %v3219_v23 }
 0x12c   : > { %v793_v63 = vrot.slane %v446_v62, %v3231_v50  ;;  %v681_v58 = vsel %vm562_vm0, %v680_v46, %v676_v41 }
 0x12d   : > { %v808_v19 = vsel %vm569_vm1, %v807_v11, %v803_v17 }
 0x12e   : > { %v794_v1 = vsel %vm576_vm2, %v793_v63, %v789_v40  ;;  %v3277_v2 = vpop.xlane.xlu1 %463 }
 0x12f   : > { %v909_v3 = vsel %vm711_vm3, %v794_v1, %v775_v0  ;;  %v3280_v4 = vpop.xlane.xlu0 %460 }
 0x132   : > { %v375_v5 = vpop.xlane.xlu1 %374 }
 0x133   : > { %v366_v6 = vpop.xlane.xlu0 %365  ;;  %v417_v35 = vmul.f32 0.00390625, %v375_v5 }
 0x134   : > { %v414_v30 = vmul.f32 0.00390625, %v366_v6 }
 0x135   : > { %v685_v38 = vrot.slane %v417_v35, %v3219_v23 }
 0x136   : > { %v384_v7 = vpop.xlane.xlu1 %383  ;;  %v671_v40 = vrot.slane %v414_v30, %v3231_v50 }
 0x137   : > { %v381_v9 = vpop.xlane.xlu0 %380  ;;  %v420_v45 = vmul.f32 0.00390625, %v384_v7  ;;  %v686_v60 = vsel %vm569_vm1, %v685_v38, %v681_v58 }
 0x138   : > { %v419_v49 = vmul.f32 0.00390625, %v381_v9  ;;  %v672_v61 = vsel %vm576_vm2, %v671_v40, %v667_v53 }
 0x139   : > { %v699_v54 = vrot.slane %v420_v45, %v3214_v13  ;;  %v720_v7 = vsel %vm719_vm7, %v672_v61, %v3271_v56 }
 0x13a   : > { %v3285_v15 = vpop.xlane.xlu1 %466  ;;  %v695_v55 = vrot.slane %v419_v49, %v3211_v14 }
 0x13b   : > { %v458_v16 = vpop.xlane.xlu0 %457  ;;  %v826_v56 = vrot.slane %v3285_v15, %v3219_v23 }
 0x13c   : > { %v812_v18 = vrot.slane %v458_v16, %v3231_v50  ;;  %v700_v0 = vsel %vm562_vm0, %v699_v54, %v695_v55 }
 0x13e   : > { %v813_v20 = vsel %vm576_vm2, %v812_v18, %v808_v19  ;;  %v3291_v21 = vpop.xlane.xlu1 %475  ;;  %v821_v18 = vrot.slane %v3277_v2, %v3214_v13  ;;  %v817_v19 = vrot.slane %v3280_v4, %v3211_v14 }
 0x13f   : > { %v3294_v22 = vsel %vm713_vm4, %v813_v20, %v909_v3  ;;  %v3296_v26 = vpop.xlane.xlu0 %472 }
 0x142   : > { %v387_v27 = vpop.xlane.xlu1 %386 }
 0x143   : > { %v378_v28 = vpop.xlane.xlu0 %377  ;;  %v421_v44 = vmul.f32 0.00390625, %v387_v27  ;;  %v840_v27 = vrot.slane %v3291_v21, %v3214_v13 }
 0x144   : > { %v418_v39 = vmul.f32 0.00390625, %v378_v28  ;;  %v836_v28 = vrot.slane %v3296_v26, %v3211_v14  ;;  %v822_v26 = vsel %vm562_vm0, %v821_v18, %v817_v19  ;;  %v1155_v18 = vsub.s32 3, %v3208_v8  ;;  %v2447_v19 = vld [vmem:[#allocation5 + $0x104] ss:$8 sps:$4 sm:$0xff]  }
 0x145   : > { %v704_v57 = vrot.slane %v421_v44, %v3219_v23 }
 0x146   : > { %v3298_v32 = vpop.xlane.xlu1 %478  ;;  %v690_v47 = vrot.slane %v418_v39, %v3231_v50  ;;  %v841_v31 = vsel %vm562_vm0, %v840_v27, %v836_v28  ;;  %v2448_v27 = vld [vmem:[#allocation5] ss:$8 sps:$4 sm:$0xff]  }
 0x147   : > { %v3300_v24 = vpop.xlane.xlu0 %469  ;;  %v705_v6 = vsel %vm569_vm1, %v704_v57, %v700_v0  ;;  %v845_v29 = vrot.slane %v3298_v32, %v3219_v23 }
 0x148   : > { %v691_v63 = vsel %vm576_vm2, %v690_v47, %v686_v60  ;;  %v831_v33 = vrot.slane %v3300_v24, %v3231_v50  ;;  %v827_v24 = vsel %vm569_vm1, %v826_v56, %v822_v26  ;;  %v2450_v56 = vld [vmem:[#allocation5 + $0x4] ss:$8 sps:$4 sm:$0xff]   ;;  %v2460_v26 = vld [vmem:[#allocation5 + $0x20] ss:$8 sps:$4 sm:$0xff]  }
 0x149   : > { %v722_v10 = vsel %vm721_vm8, %v691_v63, %v720_v7  ;;  %v846_v45 = vsel %vm569_vm1, %v845_v29, %v841_v31  ;;  %v1098_v7 = vsub.s32 0, %v3208_v8  ;;  %2068 = vmatprep.subr.bf16.mxu0 %v2450_v56  ;;  %v2453_v29 = vld [vmem:[#allocation5 + $0x114] ss:$8 sps:$4 sm:$0xff]   ;;  %v2529_v56 = vld [vmem:[#allocation5 + $0x1e0] ss:$8 sps:$4 sm:$0xff]  }
 0x14a   : > { %v3303_v51 = vpop.xlane.xlu1 %487  ;;  %v832_v49 = vsel %vm576_vm2, %v831_v33, %v827_v24  ;;  %v2451_v33 = vld [vmem:[#allocation5 + $0x110] ss:$8 sps:$4 sm:$0xff]   ;;  %v1212_v24 = vsub.s32 6, %v3208_v8  ;;  %v2465_v31 = vld [vmem:[#allocation5 + $0x134] ss:$8 sps:$4 sm:$0xff]  }
 0x14b   : > { %v485_v36 = vpop.xlane.xlu0 %484  ;;  %v859_v2 = vrot.slane %v3303_v51, %v3214_v13  ;;  %v911_v54 = vsel %vm715_vm5, %v832_v49, %v3294_v22 }
 0x14c   : > { %v855_v4 = vrot.slane %v485_v36, %v3211_v14 }
 0x14e   : > { %v482_v52 = vpop.xlane.xlu1 %481  ;;  %v860_v51 = vsel %vm562_vm0, %v859_v2, %v855_v4  ;;  %v2456_v2 = vld [vmem:[#allocation5 + $0x14] ss:$8 sps:$4 sm:$0xff]   ;;  %v2454_v4 = vld [vmem:[#allocation5 + $0x10] ss:$8 sps:$4 sm:$0xff]  }
 0x14f   : > { %v390_v59 = vpop.xlane.xlu0 %389  ;;  %v850_v34 = vrot.slane %v482_v52, %v3231_v50 }
 0x150   : > { %v422_v62 = vmul.f32 0.00390625, %v390_v59 }
 0x151   : > { %v851_v46 = vsel %vm576_vm2, %v850_v34, %v846_v45  ;;  %v1174_v34 = vsub.s32 4, %v3208_v8  ;;  %v2466_v45 = vld [vmem:[#allocation5 + $0x30] ss:$8 sps:$4 sm:$0xff]  }
 0x152   : > { %v709_v1 = vrot.slane %v422_v62, %v3231_v50  ;;  %v497_v3 = vpop.xlane.xlu1 %496  ;;  %v912_v52 = vsel %vm717_vm6, %v851_v46, %v911_v54  ;;  %v2474_v46 = vld [vmem:[#allocation5 + $0x44] ss:$8 sps:$4 sm:$0xff]  }
 0x153   : > { %v491_v5 = vpop.xlane.xlu0 %490  ;;  %v874_v39 = vrot.slane %v497_v3, %v3211_v14  ;;  %v2486_v54 = vld [vmem:[#allocation5 + $0x64] ss:$8 sps:$4 sm:$0xff]  }
 0x154   : > { %v710_v9 = vsel %vm576_vm2, %v709_v1, %v705_v6  ;;  %v864_v15 = vrot.slane %v491_v5, %v3219_v23 }
 0x155   : > { %v724_v11 = vsel %vm723_vm9, %v710_v9, %v722_v10 }
 0x156   : > { %2366 = vmatprep.mubr.msk.f32.mxu0 %vm920_vm10, %v724_v11  ;;  %v494_v12 = vpop.xlane.xlu1 %493  ;;  %v865_v44 = vsel %vm569_vm1, %v864_v15, %v860_v51  ;;  %v1117_v11 = vsub.s32 1, %v3208_v8  ;;  %v2459_v15 = vld [vmem:[#allocation5 + $0x124] ss:$8 sps:$4 sm:$0xff]  }
 0x157   : > { %v500_v16 = vpop.xlane.xlu0 %499  ;;  %v869_v35 = vrot.slane %v494_v12, %v3231_v50  ;;  %v1136_v12 = vsub.s32 2, %v3208_v8  ;;  %v2471_v51 = vld [vmem:[#allocation5 + $0x144] ss:$8 sps:$4 sm:$0xff]  }
 0x158   : > { %v878_v21 = vrot.slane %v500_v16, %v3214_v13 }
 0x159   : > { %v870_v38 = vsel %vm576_vm2, %v869_v35, %v865_v44  ;;  %v2472_v44 = vld [vmem:[#allocation5 + $0x40] ss:$8 sps:$4 sm:$0xff]  }
 0x15a   : > { %v509_v17 = vpop.xlane.xlu1 %508  ;;  %v879_v36 = vsel %vm562_vm0, %v878_v21, %v874_v39  ;;  %v913_v58 = vsel %vm719_vm7, %v870_v38, %v912_v52  ;;  %v2457_v21 = vld [vmem:[#allocation5 + $0x120] ss:$8 sps:$4 sm:$0xff]   ;;  %v2463_v39 = vld [vmem:[#allocation5 + $0x130] ss:$8 sps:$4 sm:$0xff]  }
 0x15b   : > { %v503_v20 = vpop.xlane.xlu0 %502  ;;  %v893_v40 = vrot.slane %v509_v17, %v3211_v14  ;;  %v2475_v38 = vld [vmem:[#allocation5 + $0x150] ss:$8 sps:$4 sm:$0xff]  }
 0x15c   : > { %v883_v32 = vrot.slane %v503_v20, %v3219_v23  ;;  %v2445_v20 = vld [vmem:[#allocation5 + $0x100] ss:$8 sps:$4 sm:$0xff]   ;;  %v2487_v52 = vld [vmem:[#allocation5 + $0x170] ss:$8 sps:$4 sm:$0xff]  }
 0x15e   : > { %v506_v25 = vpop.xlane.xlu1 %505  ;;  %v884_v41 = vsel %vm569_vm1, %v883_v32, %v879_v36  ;;  %v1193_v32 = vsub.s32 5, %v3208_v8  ;;  %v1231_v36 = vsub.s32 7, %v3208_v8  ;;  %v2483_v8 = vld [vmem:[#allocation5 + $0x164] ss:$8 sps:$4 sm:$0xff]  }
 0x15f   : > { %v512_v30 = vpop.xlane.xlu0 %511  ;;  %v888_v42 = vrot.slane %v506_v25, %v3231_v50  ;;  %v2462_v25 = vld [vmem:[#allocation5 + $0x24] ss:$8 sps:$4 sm:$0xff]  }
 0x160   : > { %v897_v43 = vrot.slane %v512_v30, %v3214_v13 }
 0x161   : > { %v889_v13 = vsel %vm576_vm2, %v888_v42, %v884_v41  ;;  %v2468_v42 = vld [vmem:[#allocation5 + $0x34] ss:$8 sps:$4 sm:$0xff]   ;;  %v2478_v41 = vld [vmem:[#allocation5 + $0x50] ss:$8 sps:$4 sm:$0xff]  }
 0x162   : > { %v518_v37 = vpop.xlane.xlu1 %517  ;;  %v898_v53 = vsel %vm562_vm0, %v897_v43, %v893_v40  ;;  %v914_v59 = vsel %vm721_vm8, %v889_v13, %v913_v58  ;;  %v2469_v43 = vld [vmem:[#allocation5 + $0x140] ss:$8 sps:$4 sm:$0xff]   ;;  %v2480_v40 = vld [vmem:[#allocation5 + $0x54] ss:$8 sps:$4 sm:$0xff]   ;;  %v2490_v58 = vld [vmem:[#allocation5 + $0x70] ss:$8 sps:$4 sm:$0xff]  }
 0x163   : > { %v515_v47 = vpop.xlane.xlu0 %514  ;;  %v907_v48 = vrot.slane %v518_v37, %v3231_v50  ;;  %v2477_v37 = vld [vmem:[#allocation5 + $0x154] ss:$8 sps:$4 sm:$0xff]   ;;  %v2484_v13 = vld [vmem:[#allocation5 + $0x60] ss:$8 sps:$4 sm:$0xff]  }
 0x164   : > { %v902_v55 = vrot.slane %v515_v47, %v3219_v23  ;;  %v1002_v23 = vld [vmem:[%s3768_s2] sm:$0x3] }
 0x165   : > { %2369 = vmatprep.subr.msk.mxu1 %vm1010_vm11, %v1002_v23 }
 0x166   : > { %v903_v14 = vsel %vm569_vm1, %v902_v55, %v898_v53  ;;  %2370 = vmatpush3.msk.msra.mxu1 %vm1010_vm11, %v1002_v23  ;;  %v2489_v55 = vld [vmem:[#allocation5 + $0x174] ss:$8 sps:$4 sm:$0xff]  }
 0x167   : > { %v908_v57 = vsel %vm576_vm2, %v907_v48, %v903_v14  ;;  %2109 = vmatprep.subr.bf16.mxu1 %v2447_v19  ;;  %v2481_v48 = vld [vmem:[#allocation5 + $0x160] ss:$8 sps:$4 sm:$0xff]   ;;  %v2492_v53 = vld [vmem:[#allocation5 + $0x74] ss:$8 sps:$4 sm:$0xff]   ;;  %v2495_v14 = vld [vmem:[#allocation5 + $0x184] ss:$8 sps:$4 sm:$0xff]  }
 0x168   : > { %v915_v50 = vsel %vm723_vm9, %v908_v57, %v914_v59  ;;  %v2493_v57 = vld [vmem:[#allocation5 + $0x180] ss:$8 sps:$4 sm:$0xff]   ;;  %v2498_v59 = vld [vmem:[#allocation5 + $0x84] ss:$8 sps:$4 sm:$0xff]   ;;  %v2501_v23 = vld [vmem:[#allocation5 + $0x194] ss:$8 sps:$4 sm:$0xff]  }
 0x169   : > { %2367 = vmatmul.mubr.msk.f32.vlgmr.msra.gmra.mrb[0].mxu0 %vm920_vm10, %v915_v50  ;;  %v2496_v50 = vld [vmem:[#allocation5 + $0x80] ss:$8 sps:$4 sm:$0xff]   ;;  %v2526_v19 = vld [vmem:[#allocation5 + $0xd0] ss:$8 sps:$4 sm:$0xff]  }
 0x16a   : > { %2069 = vmatpush1.bf16.msra.mxu0 %v2448_v27  ;;  %v2532_v27 = vld [vmem:[#allocation5 + $0xe0] ss:$8 sps:$4 sm:$0xff]  }
 0x16b   : > { %2070 = vmatprep.subr.bf16.mxu0 %v2456_v2  ;;  %v2540_v2 = vld [vmem:[#allocation5 + $0xf4] ss:$8 sps:$4 sm:$0xff]  }
 0x16e   : > { %2071 = vmatpush1.bf16.msra.mxu0 %v2454_v4  ;;  %v2538_v4 = vld [vmem:[#allocation5 + $0xf0] ss:$8 sps:$4 sm:$0xff]  }
 0x16f   : > { %2072 = vmatprep.subr.bf16.mxu0 %v2462_v25 }
 0x172   : > { %2073 = vmatpush1.bf16.msra.mxu0 %v2460_v26 }
 0x173   : > { %2074 = vmatprep.subr.bf16.mxu0 %v2468_v42 }
 0x176   : > { %2075 = vmatpush1.bf16.msra.mxu0 %v2466_v45  ;;  %v2556_v45 = vld [vmem:[%s2922_s20 + $0x8] sm:$0xff] }
 0x177   : > { %2076 = vmatprep.subr.bf16.mxu0 %v2474_v46  ;;  %v2557_v46 = vld [vmem:[%s2922_s20 + $0x50] sm:$0xff] }
 0x17a   : > { %2077 = vmatpush1.bf16.msra.mxu0 %v2472_v44 }
 0x17b   : > { %2078 = vmatprep.subr.bf16.mxu0 %v2480_v40 }
 0x17e   : > { %2079 = vmatpush1.bf16.msra.mxu0 %v2478_v41  ;;  %v2559_v41 = vld [vmem:[%s2922_s20 + $0x40] sm:$0xff] }
 0x17f   : > { %2080 = vmatprep.subr.bf16.mxu0 %v2486_v54  ;;  %v2561_v54 = vld [vmem:[%s2922_s20 + $0x28] sm:$0xff] }
 0x182   : > { %2081 = vmatpush1.bf16.msra.mxu0 %v2484_v13 }
 0x183   : > { %2082 = vmatprep.subr.bf16.mxu0 %v2492_v53  ;;  %v2562_v53 = vld [vmem:[%s2922_s20 + $0x48] sm:$0xff] }
 0x186   : > { %2083 = vmatpush1.bf16.msra.mxu0 %v2490_v58 }
 0x187   : > { %2084 = vmatprep.subr.bf16.mxu0 %v2498_v59 }
 0x18a   : > { %2085 = vmatpush1.bf16.msra.mxu0 %v2496_v50 }
 0x23c   : > { %v2368_v22 = vpop.f32.mrb[0].mxu0 }
 0x23d   : > { %v991_v60 = vpop.f32.mrb[1].mxu0  ;;  %v1001_v62 = vmax.f32 %v2368_v22, 0.0  ;;  %v2499_v22 = vld [vmem:[#allocation5 + $0x190] ss:$8 sps:$4 sm:$0xff]  }
 0x23e   : > { %v1000_v61 = vmax.f32 %v991_v60, 0.0  ;;  %v2504_v60 = vld [vmem:[#allocation5 + $0x94] ss:$8 sps:$4 sm:$0xff]  }
 0x23f   : > { %2086 = vmatprep.subr.bf16.mxu0 %v2504_v60 }
 0x240   : > { %2371 = vmatprep.mubr.msk.f32.mxu1 %vm1003_vm12, %v1000_v61  ;;  %v2502_v61 = vld [vmem:[#allocation5 + $0x90] ss:$8 sps:$4 sm:$0xff]  }
 0x241   : > { %2372 = vmatmul.mubr.msk.f32.vlgmr.msra.gmra.mrb[0].mxu1 %vm1003_vm12, %v1001_v62  ;;  %v2507_v62 = vld [vmem:[#allocation5 + $0x1a4] ss:$8 sps:$4 sm:$0xff]   ;;  %2087 = vmatpush1.bf16.msra.mxu0 %v2502_v61  ;;  %v2565_v61 = vld [vmem:[%s2922_s20 + $0x90] sm:$0xff] }
 0x242   : > { %2110 = vmatpush1.bf16.msra.mxu1 %v2445_v20  ;;  %v2531_v20 = vld [vmem:[#allocation5 + $0x1e4] ss:$8 sps:$4 sm:$0xff]  }
 0x243   : > { %2111 = vmatprep.subr.bf16.mxu1 %v2453_v29  ;;  %v2537_v29 = vld [vmem:[#allocation5 + $0x1f4] ss:$8 sps:$4 sm:$0xff]  }
 0x246   : > { %2112 = vmatpush1.bf16.msra.mxu1 %v2451_v33  ;;  %v2535_v33 = vld [vmem:[#allocation5 + $0x1f0] ss:$8 sps:$4 sm:$0xff]  }
 0x247   : > { %2113 = vmatprep.subr.bf16.mxu1 %v2459_v15 }
 0x24a   : > { %2114 = vmatpush1.bf16.msra.mxu1 %v2457_v21 }
 0x24b   : > { %2115 = vmatprep.subr.bf16.mxu1 %v2465_v31 }
 0x24e   : > { %2116 = vmatpush1.bf16.msra.mxu1 %v2463_v39  ;;  %v2555_v39 = vld [vmem:[%s2922_s20 + $0x18] sm:$0xff] }
 0x24f   : > { %2117 = vmatprep.subr.bf16.mxu1 %v2471_v51 }
 0x252   : > { %2118 = vmatpush1.bf16.msra.mxu1 %v2469_v43 }
 0x253   : > { %2119 = vmatprep.subr.bf16.mxu1 %v2477_v37  ;;  %v2558_v37 = vld [vmem:[%s2922_s20 + $0x58] sm:$0xff] }
 0x256   : > { %2120 = vmatpush1.bf16.msra.mxu1 %v2475_v38 }
 0x257   : > { %2121 = vmatprep.subr.bf16.mxu1 %v2483_v8  ;;  %v2560_v8 = vld [vmem:[%s2922_s20 + $0x20] sm:$0xff] }
 0x25a   : > { %2122 = vmatpush1.bf16.msra.mxu1 %v2481_v48 }
 0x25b   : > { %2123 = vmatprep.subr.bf16.mxu1 %v2489_v55 }
 0x25e   : > { %2124 = vmatpush1.bf16.msra.mxu1 %v2487_v52 }
 0x25f   : > { %2125 = vmatprep.subr.bf16.mxu1 %v2495_v14  ;;  %v2563_v14 = vld [vmem:[%s2922_s20 + $0x80] sm:$0xff] }
 0x262   : > { %2126 = vmatpush1.bf16.msra.mxu1 %v2493_v57 }
 0x263   : > { %2127 = vmatprep.subr.bf16.mxu1 %v2501_v23  ;;  %v2564_v23 = vld [vmem:[%s2922_s20 + $0x88] sm:$0xff] }
 0x266   : > { %2128 = vmatpush1.bf16.msra.mxu1 %v2499_v22 }
 0x267   : > { %2129 = vmatprep.subr.bf16.mxu1 %v2507_v62 }
 0x314   : > { %v2373_v63 = vpop.f32.mrb[0].mxu1 }
 0x315   : > { %v1080_v0 = vpop.f32.mrb[1].mxu1 }
 0x316   : > { %v1089_v1 = vadd.f32 %v2373_v63, %v1080_v0  ;;  %v2505_v63 = vld [vmem:[#allocation5 + $0x1a0] ss:$8 sps:$4 sm:$0xff]   ;;  %v2510_v0 = vld [vmem:[#allocation5 + $0xa4] ss:$8 sps:$4 sm:$0xff]  }
 0x317   : > { %2130 = vmatpush1.bf16.msra.mxu1 %v2505_v63  ;;  %2088 = vmatprep.subr.bf16.mxu0 %v2510_v0  ;;  %v2566_v63 = vld [vmem:[%s2922_s20 + $0x98] sm:$0xff] }
 0x318   : > { %v2275_v3 = vmul.f32 -1.442695, %v1089_v1  ;;  %v2508_v1 = vld [vmem:[#allocation5 + $0xa0] ss:$8 sps:$4 sm:$0xff]  }
 0x319   : > { %2089 = vmatpush1.bf16.msra.mxu0 %v2508_v1 }
 0x31a   : > { %2541 = vpow2.f32 %v2275_v3  ;;  %v2513_v3 = vld [vmem:[#allocation5 + $0x1b4] ss:$8 sps:$4 sm:$0xff]  }
 0x31b   : > { %2131 = vmatprep.subr.bf16.mxu1 %v2513_v3 }
 0x324   : > { %v2542_v5 = vpop.eup %2541 }
 0x325   : > { %v1093_v6 = vadd.f32 1.0, %v2542_v5  ;;  %v2511_v5 = vld [vmem:[#allocation5 + $0x1b0] ss:$8 sps:$4 sm:$0xff]  }
 0x326   : > { %2132 = vmatpush1.bf16.msra.mxu1 %v2511_v5 }
 0x327   : > { %2543 = vrcp.f32 %v1093_v6  ;;  %v2516_v6 = vld [vmem:[#allocation5 + $0xb4] ss:$8 sps:$4 sm:$0xff]  }
 0x328   : > { %2090 = vmatprep.subr.bf16.mxu0 %v2516_v6  ;;  %v2567_v6 = vld [vmem:[%s2922_s20 + $0x60] sm:$0xff] }
 0x331   : > { %v3384_v9 = vpop.eup %2543 }
 0x332   : > { %v1099_v10 = vrot.slane %v3384_v9, %v1098_v7  ;;  %v1118_v16 = vrot.slane %v3384_v9, %v1117_v11  ;;  %v1137_v17 = vrot.slane %v3384_v9, %v1136_v12  ;;  %v1156_v28 = vrot.slane %v3384_v9, %v1155_v18  ;;  %v2514_v7 = vld [vmem:[#allocation5 + $0xb0] ss:$8 sps:$4 sm:$0xff]   ;;  %v2522_v11 = vld [vmem:[#allocation5 + $0xc4] ss:$8 sps:$4 sm:$0xff]   ;;  %v2520_v12 = vld [vmem:[#allocation5 + $0xc0] ss:$8 sps:$4 sm:$0xff]  }
 0x333   : > { %v1175_v35 = vrot.slane %v3384_v9, %v1174_v34  ;;  %v1194_v30 = vrot.slane %v3384_v9, %v1193_v32  ;;  %v1213_v49 = vrot.slane %v3384_v9, %v1212_v24  ;;  %v1232_v47 = vrot.slane %v3384_v9, %v1231_v36  ;;  %v2519_v9 = vld [vmem:[#allocation5 + $0x1c4] ss:$8 sps:$4 sm:$0xff]   ;;  %2091 = vmatpush1.bf16.msra.mxu0 %v2514_v7  ;;  %v2528_v18 = vld [vmem:[#allocation5 + $0xd4] ss:$8 sps:$4 sm:$0xff]  }
 0x334   : > { %1105 = vbcast.lane.b32.xlu1 %v1099_v10, 264  ;;  %1101 = vbcast.lane.b32.xlu0 %v1099_v10, 256  ;;  %v2553_v32 = vld [vmem:[%s2922_s20 + $0x10] sm:$0xff]  ;;  %v2554_v24 = vld [vmem:[%s2922_s20] sm:$0xff] }
 0x335   : > { %2133 = vmatprep.subr.bf16.mxu1 %v2519_v9  ;;  %2092 = vmatprep.subr.bf16.mxu0 %v2522_v11  ;;  %v2568_v11 = vld [vmem:[%s2922_s20 + $0x68] sm:$0xff] }
 0x337   : > { %2093 = vmatpush1.bf16.msra.mxu0 %v2520_v12 }
 0x338   : > { %1120 = vbcast.lane.b32.xlu1 %v1118_v16, 256  ;;  %1139 = vbcast.lane.b32.xlu0 %v1137_v17, 256 }
 0x339   : > { %2094 = vmatprep.subr.bf16.mxu0 %v2528_v18 }
 0x33b   : > { %2095 = vmatpush1.bf16.msra.mxu0 %v2526_v19 }
 0x33c   : > { %1124 = vbcast.lane.b32.xlu1 %v1118_v16, 264  ;;  %1109 = vbcast.lane.b32.xlu0 %v1099_v10, 272 }
 0x340   : > { %1143 = vbcast.lane.b32.xlu1 %v1137_v17, 264  ;;  %1158 = vbcast.lane.b32.xlu0 %v1156_v28, 256 }
 0x344   : > { %1128 = vbcast.lane.b32.xlu1 %v1118_v16, 272  ;;  %1147 = vbcast.lane.b32.xlu0 %v1137_v17, 272 }
 0x348   : > { %1162 = vbcast.lane.b32.xlu1 %v1156_v28, 264  ;;  %1181 = vbcast.lane.b32.xlu0 %v1175_v35, 264 }
 0x34c   : > { %1177 = vbcast.lane.b32.xlu1 %v1175_v35, 256  ;;  %1132 = vbcast.lane.b32.xlu0 %v1118_v16, 280  ;;  %v2525_v16 = vld [vmem:[#allocation5 + $0x1d4] ss:$8 sps:$4 sm:$0xff]  }
 0x350   : > { %1113 = vbcast.lane.b32.xlu1 %v1099_v10, 280  ;;  %1196 = vbcast.lane.b32.xlu0 %v1194_v30, 256  ;;  %v2517_v10 = vld [vmem:[#allocation5 + $0x1c0] ss:$8 sps:$4 sm:$0xff]  }
 0x351   : > { %2134 = vmatpush1.bf16.msra.mxu1 %v2517_v10 }
 0x352   : > { %2135 = vmatprep.subr.bf16.mxu1 %v2525_v16  ;;  %v2569_v16 = vld [vmem:[%s2922_s20 + $0xa0] sm:$0xff] }
 0x354   : > { %1166 = vbcast.lane.b32.xlu1 %v1156_v28, 272  ;;  %1151 = vbcast.lane.b32.xlu0 %v1137_v17, 280  ;;  %v2523_v17 = vld [vmem:[#allocation5 + $0x1d0] ss:$8 sps:$4 sm:$0xff]  }
 0x355   : > { %2136 = vmatpush1.bf16.msra.mxu1 %v2523_v17 }
 0x356   : > { %2137 = vmatprep.subr.bf16.mxu1 %v2531_v20  ;;  %v2570_v20 = vld [vmem:[%s2922_s20 + $0xc0] sm:$0xff] }
 0x358   : > { %1200 = vbcast.lane.b32.xlu1 %v1194_v30, 264  ;;  %1215 = vbcast.lane.b32.xlu0 %v1213_v49, 256 }
 0x359   : > { %2138 = vmatpush1.bf16.msra.mxu1 %v2529_v56 }
 0x35a   : > { %2139 = vmatprep.subr.bf16.mxu1 %v2537_v29 }
 0x35c   : > { %1185 = vbcast.lane.b32.xlu1 %v1175_v35, 272  ;;  %1170 = vbcast.lane.b32.xlu0 %v1156_v28, 280  ;;  %v2534_v28 = vld [vmem:[#allocation5 + $0xe4] ss:$8 sps:$4 sm:$0xff]  }
 0x35d   : > { %2096 = vmatprep.subr.bf16.mxu0 %v2534_v28  ;;  %2140 = vmatpush1.bf16.msra.mxu1 %v2535_v33 }
 0x35e   : > { %2097 = vmatpush1.bf16.msra.mxu0 %v2532_v27  ;;  %v2571_v27 = vld [vmem:[%s2922_s20 + $0xa8] sm:$0xff] }
 0x35f   : > { %2098 = vmatprep.subr.bf16.mxu0 %v2540_v2 }
 0x360   : > { %1219 = vbcast.lane.b32.xlu1 %v1213_v49, 264  ;;  %1234 = vbcast.lane.b32.xlu0 %v1232_v47, 256 }
 0x362   : > { %2099 = vmatpush1.bf16.msra.mxu0 %v2538_v4 }
 0x364   : > { %1204 = vbcast.lane.b32.xlu1 %v1194_v30, 272  ;;  %1189 = vbcast.lane.b32.xlu0 %v1175_v35, 280 }
 0x368   : > { %1238 = vbcast.lane.b32.xlu1 %v1232_v47, 264  ;;  %1208 = vbcast.lane.b32.xlu0 %v1194_v30, 280 }
 0x36c   : > { %1223 = vbcast.lane.b32.xlu1 %v1213_v49, 272  ;;  %1227 = vbcast.lane.b32.xlu0 %v1213_v49, 280 }
 0x370   : > { %1242 = vbcast.lane.b32.xlu1 %v1232_v47, 272 }
 0x374   : > { %1246 = vbcast.lane.b32.xlu1 %v1232_v47, 280 }
 0x3a6   : > { %v1106_v34 = vpop.permute.xlu1 %1105  ;;  %v1102_v15 = vpop.permute.xlu0 %1101 }
 0x3a7   : > { %v1250_v30 = vmul.f32 %v2553_v32, %v1106_v34  ;;  %v1248_v31 = vmul.f32 %v2554_v24, %v1102_v15  ;;  %v1251_v42 = vmul.f32 %v2555_v39, %v1106_v34  ;;  %v1249_v49 = vmul.f32 %v2556_v45, %v1102_v15  ;;  %v2572_v15 = vld [vmem:[%s2922_s20 + $0xc8] sm:$0xff] }
 0x3a9   : > { %v1312_v36 = vadd.f32 %v1250_v30, %v1248_v31  ;;  %v1321_v40 = vadd.f32 %v1251_v42, %v1249_v49  ;;  %v1472_v55 = vmax.f32 %v1248_v31, %v1250_v30  ;;  %v1481_v52 = vmax.f32 %v1249_v49, %v1251_v42  ;;  %v2574_v30 = vld [vmem:[%s2922_s20 + $0xd8] sm:$0xff] }
 0x3aa   : > { %v1121_v21 = vpop.permute.xlu1 %1120  ;;  %v1140_v25 = vpop.permute.xlu0 %1139 }
 0x3ab   : > { %v1256_v47 = vmul.f32 %v2559_v41, %v1121_v21  ;;  %v1257_v58 = vmul.f32 %v2562_v53, %v1121_v21  ;;  %v1264_v57 = vmul.f32 %v2563_v14, %v1140_v25  ;;  %v1265_v22 = vmul.f32 %v2564_v23, %v1140_v25 }
 0x3ae   : > { %v1125_v26 = vpop.permute.xlu1 %1124  ;;  %v1110_v35 = vpop.permute.xlu0 %1109 }
 0x3af   : > { %v1258_v44 = vmul.f32 %v2557_v46, %v1125_v26  ;;  %v1259_v38 = vmul.f32 %v2558_v37, %v1125_v26  ;;  %v1252_v48 = vmul.f32 %v2560_v8, %v1110_v35  ;;  %v1253_v13 = vmul.f32 %v2561_v54, %v1110_v35  ;;  %v2573_v35 = vld [vmem:[%s2922_s20 + $0xd0] sm:$0xff] }
 0x3b1   : > { %v1330_v60 = vadd.f32 %v1258_v44, %v1256_v47  ;;  %v1339_v1 = vadd.f32 %v1259_v38, %v1257_v58  ;;  %v1490_v3 = vmax.f32 %v1256_v47, %v1258_v44  ;;  %v1499_v5 = vmax.f32 %v1257_v58, %v1259_v38  ;;  %v2576_v44 = vld [vmem:[%s2922_s20 + $0x118] sm:$0xff]  ;;  %v2578_v47 = vld [vmem:[%s2922_s20 + $0x108] sm:$0xff] }
 0x3b2   : > { %v1144_v51 = vpop.permute.xlu1 %1143  ;;  %v1159_v43 = vpop.permute.xlu0 %1158  ;;  %v3416_v9 = vadd.f32 %v1312_v36, %v1252_v48  ;;  %v3418_v10 = vadd.f32 %v1321_v40, %v1253_v13  ;;  %v3422_v18 = vmax.f32 %v1472_v55, %v1252_v48  ;;  %v3424_v19 = vmax.f32 %v1481_v52, %v1253_v13  ;;  %v2577_v40 = vld [vmem:[%s2922_s20 + $0x100] sm:$0xff]  ;;  %v2579_v48 = vld [vmem:[%s2922_s20 + $0x70] sm:$0xff]  ;;  %v2580_v13 = vld [vmem:[%s2922_s20 + $0x78] sm:$0xff] }
 0x3b3   : > { %v1266_v62 = vmul.f32 %v2565_v61, %v1144_v51  ;;  %v1267_v0 = vmul.f32 %v2566_v63, %v1144_v51  ;;  %v3427_v56 = vmul.f32 %v2570_v20, %v1159_v43  ;;  %v3431_v21 = vmul.f32 %v2572_v15, %v1159_v43  ;;  %v2575_v43 = vld [vmem:[%s2922_s20 + $0x110] sm:$0xff] }
 0x3b5   : > { %v1348_v2 = vadd.f32 %v1266_v62, %v1264_v57  ;;  %v1357_v4 = vadd.f32 %v1267_v0, %v1265_v22  ;;  %v1508_v34 = vmax.f32 %v1264_v57, %v1266_v62  ;;  %v1517_v25 = vmax.f32 %v1265_v22, %v1267_v0 }
 0x3b6   : > { %v1129_v59 = vpop.permute.xlu1 %1128  ;;  %v1148_v50 = vpop.permute.xlu0 %1147 }
 0x3b7   : > { %v1260_v7 = vmul.f32 %v2567_v6, %v1129_v59  ;;  %v1261_v12 = vmul.f32 %v2568_v11, %v1129_v59  ;;  %v1268_v17 = vmul.f32 %v2569_v16, %v1148_v50  ;;  %v1269_v28 = vmul.f32 %v2571_v27, %v1148_v50  ;;  %v2582_v6 = vld [vmem:[%s2922_s20 + $0x38] sm:$0xff]  ;;  %v2583_v11 = vld [vmem:[%s2922_s20 + $0x140] sm:$0xff] }
 0x3b9   : > { %v1331_v26 = vadd.f32 %v1330_v60, %v1260_v7  ;;  %v1340_v31 = vadd.f32 %v1339_v1, %v1261_v12  ;;  %v1491_v39 = vmax.f32 %v1490_v3, %v1260_v7  ;;  %v1500_v42 = vmax.f32 %v1499_v5, %v1261_v12  ;;  %v2581_v3 = vld [vmem:[%s2922_s20 + $0x30] sm:$0xff] }
 0x3ba   : > { %v1163_v29 = vpop.permute.xlu1 %1162  ;;  %v1182_v33 = vpop.permute.xlu0 %1181  ;;  %v3439_v45 = vadd.f32 %v1348_v2, %v1268_v17  ;;  %v3441_v49 = vadd.f32 %v1357_v4, %v1269_v28  ;;  %v3443_v51 = vmax.f32 %v1508_v34, %v1268_v17  ;;  %v3459_v52 = vmax.f32 %v1517_v25, %v1269_v28 }
 0x3bb   : > { %v3434_v32 = vmul.f32 %v2573_v35, %v1163_v29  ;;  %v3437_v24 = vmul.f32 %v2574_v30, %v1163_v29  ;;  %v3446_v46 = vmul.f32 %v2575_v43, %v1182_v33  ;;  %v3449_v36 = vmul.f32 %v2576_v44, %v1182_v33 }
 0x3bd   : > { %v3463_v53 = vadd.f32 %v3434_v32, %v3427_v56  ;;  %v3467_v58 = vadd.f32 %v3437_v24, %v3431_v21  ;;  %v1526_v14 = vmax.f32 %v3427_v56, %v3434_v32  ;;  %v1535_v57 = vmax.f32 %v3431_v21, %v3437_v24  ;;  %v2591_v24 = vld [vmem:[%s2922_s20 + $0x180] sm:$0xff] }
 0x3be   : > { %v1178_v37 = vpop.permute.xlu1 %1177  ;;  %v1133_v38 = vpop.permute.xlu0 %1132 }
 0x3bf   : > { %v3452_v41 = vmul.f32 %v2577_v40, %v1178_v37  ;;  %v3455_v8 = vmul.f32 %v2578_v47, %v1178_v37  ;;  %v1262_v54 = vmul.f32 %v2579_v48, %v1133_v38  ;;  %v1263_v55 = vmul.f32 %v2580_v13, %v1133_v38 }
 0x3c1   : > { %v3475_v59 = vadd.f32 %v3446_v46, %v3452_v41  ;;  %v3479_v50 = vadd.f32 %v3449_v36, %v3455_v8  ;;  %v1544_v23 = vmax.f32 %v3452_v41, %v3446_v46  ;;  %v1332_v22 = vadd.f32 %v1331_v26, %v1262_v54 }
 0x3c2   : > { %v1341_v60 = vadd.f32 %v1340_v31, %v1263_v55  ;;  %v1492_v61 = vmax.f32 %v1491_v39, %v1262_v54  ;;  %v1501_v62 = vmax.f32 %v1500_v42, %v1263_v55  ;;  %v1114_v63 = vpop.permute.xlu1 %1113  ;;  %v1197_v0 = vpop.permute.xlu0 %1196  ;;  %v1553_v1 = vmax.f32 %v3455_v8, %v3449_v36 }
 0x3c3   : > { %v1254_v5 = vmul.f32 %v2581_v3, %v1114_v63  ;;  %v1255_v7 = vmul.f32 %v2582_v6, %v1114_v63  ;;  %v3488_v12 = vmul.f32 %v2583_v11, %v1197_v0  ;;  %v1333_v16 = vrot.slane %v1332_v22, 4 }
 0x3c4   : > { %v1342_v17 = vrot.slane %v1341_v60, 4  ;;  %v1493_v20 = vrot.slane %v1492_v61, 4  ;;  %v1502_v27 = vrot.slane %v1501_v62, 4 }
 0x3c5   : > { %v1314_v28 = vadd.f32 %v3416_v9, %v1254_v5  ;;  %v1323_v29 = vadd.f32 %v3418_v10, %v1255_v7  ;;  %v1474_v33 = vmax.f32 %v3422_v18, %v1254_v5  ;;  %v1483_v2 = vmax.f32 %v3424_v19, %v1255_v7 }
 0x3c6   : > { %v1334_v4 = vadd.f32 %v1333_v16, %v1332_v22  ;;  %v1343_v34 = vadd.f32 %v1342_v17, %v1341_v60  ;;  %v1494_v15 = vmax.f32 %v1492_v61, %v1493_v20  ;;  %v1503_v25 = vmax.f32 %v1501_v62, %v1502_v27  ;;  %v1167_v48 = vpop.permute.xlu1 %1166  ;;  %v1152_v54 = vpop.permute.xlu0 %1151  ;;  %v2584_v27 = vld [vmem:[%s2922_s20 + $0x148] sm:$0xff] }
 0x3c7   : > { %v1315_v26 = vrot.slane %v1314_v28, 4  ;;  %v1324_v35 = vrot.slane %v1323_v29, 4  ;;  %v1475_v30 = vrot.slane %v1474_v33, 4  ;;  %v1484_v31 = vrot.slane %v1483_v2, 4 }
 0x3c8   : > { %v1335_v39 = vrot.slane %v1334_v4, 2  ;;  %v1344_v42 = vrot.slane %v1343_v34, 2  ;;  %v1495_v43 = vrot.slane %v1494_v15, 2  ;;  %v1504_v44 = vrot.slane %v1503_v25, 2 }
 0x3c9   : > { %v1316_v37 = vadd.f32 %v1315_v26, %v1314_v28  ;;  %v1325_v9 = vadd.f32 %v1324_v35, %v1323_v29  ;;  %v1476_v38 = vmax.f32 %v1474_v33, %v1475_v30  ;;  %v1485_v10 = vmax.f32 %v1483_v2, %v1484_v31  ;;  %v2586_v35 = vld [vmem:[%s2922_s20 + $0xe8] sm:$0xff] }
 0x3ca   : > { %v1336_v40 = vadd.f32 %v1335_v39, %v1334_v4  ;;  %v1345_v18 = vadd.f32 %v1344_v42, %v1343_v34  ;;  %v1496_v47 = vmax.f32 %v1494_v15, %v1495_v43  ;;  %v1505_v19 = vmax.f32 %v1503_v25, %v1504_v44  ;;  %v2585_v25 = vld [vmem:[%s2922_s20 + $0xe0] sm:$0xff]  ;;  %v1201_v31 = vpop.permute.xlu1 %1200  ;;  %v1216_v39 = vpop.permute.xlu0 %1215 }
 0x3cb   : > { %v1317_v13 = vrot.slane %v1316_v37, 2  ;;  %v1326_v55 = vrot.slane %v1325_v9, 2  ;;  %v1477_v22 = vrot.slane %v1476_v38, 2  ;;  %v1486_v60 = vrot.slane %v1485_v10, 2 }
 0x3cc   : > { %v1337_v61 = vrot.slane %v1336_v40, 1  ;;  %v1346_v62 = vrot.slane %v1345_v18, 1  ;;  %v1497_v63 = vrot.slane %v1496_v47, 1  ;;  %v1506_v3 = vrot.slane %v1505_v19, 1 }
 0x3cd   : > { %v1318_v5 = vadd.f32 %v1317_v13, %v1316_v37  ;;  %v1327_v6 = vadd.f32 %v1326_v55, %v1325_v9  ;;  %v1478_v7 = vmax.f32 %v1476_v38, %v1477_v22  ;;  %v1487_v11 = vmax.f32 %v1485_v10, %v1486_v60  ;;  %v2588_v55 = vld [vmem:[%s2922_s20 + $0xb8] sm:$0xff]  ;;  %v2589_v22 = vld [vmem:[%s2922_s20 + $0x150] sm:$0xff] }
 0x3ce   : > { %v1338_v16 = vadd.f32 %v1337_v61, %v1336_v40  ;;  %v1347_v17 = vadd.f32 %v1346_v62, %v1345_v18  ;;  %v1498_v20 = vmax.f32 %v1496_v47, %v1497_v63  ;;  %v3495_v28 = vmul.f32 %v2584_v27, %v1197_v0  ;;  %v2590_v60 = vld [vmem:[%s2922_s20 + $0x158] sm:$0xff] }
 0x3cf   : > { %v1319_v29 = vrot.slane %v1318_v5, 1  ;;  %v1328_v33 = vrot.slane %v1327_v6, 1  ;;  %v1479_v2 = vrot.slane %v1478_v7, 1  ;;  %v1488_v4 = vrot.slane %v1487_v11, 1 }
 0x3d0   : > { %v1458_v34 = vmul.f32 0.03125, %v1338_v16  ;;  %v1507_v15 = vmax.f32 %v1505_v19, %v1506_v3  ;;  %v1276_v26 = vmul.f32 %v2585_v25, %v1167_v48  ;;  %v1277_v30 = vmul.f32 %v2586_v35, %v1167_v48  ;;  %v2587_v48 = vld [vmem:[%s2922_s20 + $0xb0] sm:$0xff]  ;;  %v1186_v3 = vpop.permute.xlu1 %1185 }
 0x3d1   : > { %v1320_v42 = vadd.f32 %v1319_v29, %v1318_v5  ;;  %v1329_v43 = vadd.f32 %v1328_v33, %v1327_v6  ;;  %v1480_v44 = vmax.f32 %v1478_v7, %v1479_v2  ;;  %v1489_v0 = vmax.f32 %v1487_v11, %v1488_v4  ;;  %v1171_v5 = vpop.permute.xlu0 %1170  ;;  %v2594_v29 = vld [vmem:[%s2922_s20 + $0x128] sm:$0xff]  ;;  %v2595_v2 = vld [vmem:[%s2922_s20 + $0xf0] sm:$0xff] }
 0x3d2   : > { %v1459_v37 = vmul.f32 0.03125, %v1347_v17  ;;  %v1367_v9 = vadd.f32 %v3463_v53, %v1276_v26  ;;  %v1376_v38 = vadd.f32 %v3467_v58, %v1277_v30  ;;  %v1527_v10 = vmax.f32 %v1526_v14, %v1276_v26 }
 0x3d3   : > { %v1456_v40 = vmul.f32 0.03125, %v1320_v42  ;;  %v1457_v18 = vmul.f32 0.03125, %v1329_v43  ;;  %v3505_v47 = vsel %vm711_vm3, %v1498_v20, %v1480_v44  ;;  %v1536_v19 = vmax.f32 %v1535_v57, %v1277_v30  ;;  %v2593_v20 = vld [vmem:[%s2922_s20 + $0x120] sm:$0xff] }
 0x3d4   : > { %v1270_v13 = vmul.f32 %v2587_v48, %v1152_v54  ;;  %v1271_v53 = vmul.f32 %v2588_v55, %v1152_v54  ;;  %v3513_v58 = vmul.f32 %v2589_v22, %v1201_v31  ;;  %v3516_v56 = vmul.f32 %v2590_v60, %v1201_v31 }
 0x3d5   : > { %v3519_v32 = vsel %vm711_vm3, %v1458_v34, %v1456_v40  ;;  %v3522_v14 = vsel %vm711_vm3, %v1459_v37, %v1457_v18  ;;  %v3525_v21 = vsel %vm711_vm3, %v1507_v15, %v1489_v0  ;;  %v3528_v57 = vmul.f32 %v2591_v24, %v1216_v39  ;;  %v2596_v34 = vld [vmem:[%s2922_s20 + $0xf8] sm:$0xff]  ;;  %v1235_v46 = vpop.permute.xlu0 %1234 }
 0x3d6   : > { %v1350_v54 = vadd.f32 %v3439_v45, %v1270_v13  ;;  %v1359_v61 = vadd.f32 %v3441_v49, %v1271_v53  ;;  %v1510_v62 = vmax.f32 %v3443_v51, %v1270_v13  ;;  %v1519_v63 = vmax.f32 %v3459_v52, %v1271_v53  ;;  %v2592_v49 = vld [vmem:[%s2922_s20 + $0x188] sm:$0xff] }
 0x3d7   : > { %v3536_v6 = vadd.f32 %v3513_v58, %v3488_v12  ;;  %v3540_v7 = vadd.f32 %v3516_v56, %v3495_v28  ;;  %v1562_v45 = vmax.f32 %v3488_v12, %v3513_v58  ;;  %v3545_v11 = vmul.f32 %v2592_v49, %v1216_v39  ;;  %v2608_v12 = vld [vmem:[%s2922_s20 + $0x178] sm:$0xff] }
 0x3d8   : > { %v1351_v51 = vrot.slane %v1350_v54, 4  ;;  %v1360_v52 = vrot.slane %v1359_v61, 4  ;;  %v1511_v16 = vrot.slane %v1510_v62, 4  ;;  %v1520_v17 = vrot.slane %v1519_v63, 4 }
 0x3d9   : > { %v1284_v27 = vmul.f32 %v2593_v20, %v1186_v3  ;;  %v1285_v33 = vmul.f32 %v2594_v29, %v1186_v3  ;;  %v1278_v4 = vmul.f32 %v2595_v2, %v1171_v5  ;;  %v1279_v15 = vmul.f32 %v2596_v34, %v1171_v5 }
 0x3da   : > { %v1352_v25 = vadd.f32 %v1351_v51, %v1350_v54  ;;  %v1361_v26 = vadd.f32 %v1360_v52, %v1359_v61  ;;  %v1512_v35 = vmax.f32 %v1510_v62, %v1511_v16  ;;  %v1521_v30 = vmax.f32 %v1519_v63, %v1520_v17  ;;  %v1220_v62 = vpop.permute.xlu1 %1219 }
 0x3db   : > { %v1571_v31 = vmax.f32 %v3495_v28, %v3516_v56  ;;  %v3554_v39 = vadd.f32 %v3475_v59, %v1284_v27  ;;  %v3557_v42 = vadd.f32 %v3479_v50, %v1285_v33  ;;  %v3562_v43 = vmax.f32 %v1544_v23, %v1284_v27 }
 0x3dc   : > { %v1353_v44 = vrot.slane %v1352_v25, 2  ;;  %v1362_v0 = vrot.slane %v1361_v26, 2  ;;  %v1513_v37 = vrot.slane %v1512_v35, 2  ;;  %v1522_v40 = vrot.slane %v1521_v30, 2 }
 0x3dd   : > { %v1368_v18 = vadd.f32 %v1367_v9, %v1278_v4  ;;  %v1377_v48 = vadd.f32 %v1376_v38, %v1279_v15  ;;  %v1528_v13 = vmax.f32 %v1527_v10, %v1278_v4  ;;  %v1537_v55 = vmax.f32 %v1536_v19, %v1279_v15 }
 0x3de   : > { %v1354_v53 = vadd.f32 %v1353_v44, %v1352_v25  ;;  %v1363_v22 = vadd.f32 %v1362_v0, %v1361_v26  ;;  %v1514_v59 = vmax.f32 %v1512_v35, %v1513_v37  ;;  %v1523_v60 = vmax.f32 %v1521_v30, %v1522_v40  ;;  %v1205_v30 = vpop.permute.xlu1 %1204  ;;  %v1190_v44 = vpop.permute.xlu0 %1189  ;;  %v2597_v40 = vld [vmem:[%s2922_s20 + $0x190] sm:$0xff] }
 0x3df   : > { %v1369_v24 = vrot.slane %v1368_v18, 4  ;;  %v1378_v50 = vrot.slane %v1377_v48, 4  ;;  %v1529_v54 = vrot.slane %v1528_v13, 4  ;;  %v1538_v61 = vrot.slane %v1537_v55, 4 }
 0x3e0   : > { %v1355_v41 = vrot.slane %v1354_v53, 1  ;;  %v1364_v23 = vrot.slane %v1363_v22, 1  ;;  %v1515_v63 = vrot.slane %v1514_v59, 1  ;;  %v1524_v3 = vrot.slane %v1523_v60, 1 }
 0x3e1   : > { %v1370_v5 = vadd.f32 %v1369_v24, %v1368_v18  ;;  %v1379_v49 = vadd.f32 %v1378_v50, %v1377_v48  ;;  %v1530_v9 = vmax.f32 %v1528_v13, %v1529_v54  ;;  %v1539_v38 = vmax.f32 %v1537_v55, %v1538_v61  ;;  %v2599_v24 = vld [vmem:[%s2922_s20 + $0x1c0] sm:$0xff] }
 0x3e2   : > { %v1356_v10 = vadd.f32 %v1355_v41, %v1354_v53  ;;  %v1365_v19 = vadd.f32 %v1364_v23, %v1363_v22  ;;  %v1516_v51 = vmax.f32 %v1514_v59, %v1515_v63  ;;  %v1525_v52 = vmax.f32 %v1523_v60, %v1524_v3  ;;  %v2600_v54 = vld [vmem:[%s2922_s20 + $0x160] sm:$0xff]  ;;  %v2602_v3 = vld [vmem:[%s2922_s20 + $0x1c8] sm:$0xff] }
 0x3e3   : > { %v1371_v16 = vrot.slane %v1370_v5, 2  ;;  %v1380_v17 = vrot.slane %v1379_v49, 2  ;;  %v1531_v20 = vrot.slane %v1530_v9, 2  ;;  %v1540_v27 = vrot.slane %v1539_v38, 2 }
 0x3e4   : > { %v1460_v29 = vmul.f32 0.03125, %v1356_v10  ;;  %v1461_v2 = vmul.f32 0.03125, %v1365_v19  ;;  %v1665_v4 = vsel %vm713_vm4, %v1516_v51, %v3505_v47  ;;  %v1554_v34 = vmax.f32 %v1553_v1, %v1285_v33  ;;  %v2598_v47 = vld [vmem:[%s2922_s20 + $0x198] sm:$0xff]  ;;  %v1209_v10 = vpop.permute.xlu0 %1208 }
 0x3e5   : > { %v1372_v15 = vadd.f32 %v1371_v16, %v1370_v5  ;;  %v1381_v25 = vadd.f32 %v1380_v17, %v1379_v49  ;;  %v1532_v26 = vmax.f32 %v1530_v9, %v1531_v20  ;;  %v1541_v35 = vmax.f32 %v1539_v38, %v1540_v27  ;;  %v2603_v49 = vld [vmem:[%s2922_s20 + $0x130] sm:$0xff]  ;;  %v1239_v38 = vpop.permute.xlu1 %1238  ;;  %v2604_v17 = vld [vmem:[%s2922_s20 + $0x138] sm:$0xff] }
 0x3e6   : > { %v1633_v0 = vsel %vm713_vm4, %v1460_v29, %v3519_v32  ;;  %v3573_v37 = vsel %vm713_vm4, %v1525_v52, %v3525_v21  ;;  %v3576_v18 = vmul.f32 %v2597_v40, %v1220_v62  ;;  %v3579_v36 = vmul.f32 %v2598_v47, %v1220_v62  ;;  %v2601_v62 = vld [vmem:[%s2922_s20 + $0x168] sm:$0xff] }
 0x3e7   : > { %v1373_v8 = vrot.slane %v1372_v15, 1  ;;  %v1382_v1 = vrot.slane %v1381_v25, 1  ;;  %v1533_v33 = vrot.slane %v1532_v26, 1  ;;  %v1542_v48 = vrot.slane %v1541_v35, 1 }
 0x3e8   : > { %v3583_v32 = vsel %vm713_vm4, %v1461_v2, %v3522_v14  ;;  %v3587_v21 = vadd.f32 %v3576_v18, %v3528_v57  ;;  %v3591_v13 = vadd.f32 %v3579_v36, %v3545_v11  ;;  %v1580_v55 = vmax.f32 %v3528_v57, %v3576_v18  ;;  %v2605_v2 = vld [vmem:[%s2922_s20 + $0x1d0] sm:$0xff] }
 0x3e9   : > { %v1374_v53 = vadd.f32 %v1373_v8, %v1372_v15  ;;  %v1383_v22 = vadd.f32 %v1382_v1, %v1381_v25  ;;  %v1534_v59 = vmax.f32 %v1532_v26, %v1533_v33  ;;  %v1589_v14 = vmax.f32 %v3545_v11, %v3579_v36  ;;  %v1224_v1 = vpop.permute.xlu1 %1223 }
 0x3ea   : > { %v3597_v60 = vmax.f32 %v1541_v35, %v1542_v48  ;;  %v3600_v50 = vmul.f32 %v2599_v24, %v1235_v46  ;;  %v1292_v61 = vmul.f32 %v2600_v54, %v1205_v30  ;;  %v1293_v41 = vmul.f32 %v2601_v62, %v1205_v30 }
 0x3eb   : > { %v1462_v23 = vmul.f32 0.03125, %v1374_v53  ;;  %v3604_v63 = vmul.f32 0.03125, %v1383_v22  ;;  %v3607_v5 = vmul.f32 %v2602_v3, %v1235_v46  ;;  %v1286_v9 = vmul.f32 %v2603_v49, %v1190_v44 }
 0x3ec   : > { %v3611_v19 = vsel %vm715_vm5, %v1534_v59, %v1665_v4  ;;  %v1403_v51 = vadd.f32 %v3536_v6, %v1292_v61  ;;  %v1412_v52 = vadd.f32 %v3540_v7, %v1293_v41  ;;  %v1563_v16 = vmax.f32 %v1562_v45, %v1292_v61  ;;  %v2606_v6 = vld [vmem:[%s2922_s20 + $0x1d8] sm:$0xff]  ;;  %v2607_v7 = vld [vmem:[%s2922_s20 + $0x170] sm:$0xff] }
 0x3ed   : > { %v1572_v46 = vmax.f32 %v1571_v31, %v1293_v41  ;;  %v1287_v20 = vmul.f32 %v2604_v17, %v1190_v44  ;;  %v1386_v27 = vadd.f32 %v3554_v39, %v1286_v9  ;;  %v1546_v29 = vmax.f32 %v3562_v43, %v1286_v9 }
 0x3ee   : > { %v3625_v4 = vmul.f32 %v2605_v2, %v1239_v38  ;;  %v3628_v15 = vmul.f32 %v2606_v6, %v1239_v38  ;;  %v1294_v25 = vmul.f32 %v2607_v7, %v1209_v10  ;;  %v1295_v58 = vmul.f32 %v2608_v12, %v1209_v10  ;;  %v1243_v2 = vpop.permute.xlu1 %1242 }
 0x3ef   : > { %v1387_v45 = vrot.slane %v1386_v27, 4  ;;  %v1395_v28 = vadd.f32 %v3557_v42, %v1287_v20  ;;  %v1547_v56 = vrot.slane %v1546_v29, 4  ;;  %v1555_v31 = vmax.f32 %v1554_v34, %v1287_v20 }
 0x3f0   : > { %v3634_v26 = vsel %vm715_vm5, %v1462_v23, %v1633_v0  ;;  %v3638_v39 = vadd.f32 %v3625_v4, %v3600_v50  ;;  %v3642_v43 = vadd.f32 %v3628_v15, %v3607_v5  ;;  %v1598_v35 = vmax.f32 %v3600_v50, %v3625_v4 }
 0x3f1   : > { %v1388_v30 = vadd.f32 %v1387_v45, %v1386_v27  ;;  %v1396_v44 = vrot.slane %v1395_v28, 4  ;;  %v1548_v40 = vmax.f32 %v1546_v29, %v1547_v56  ;;  %v1556_v42 = vrot.slane %v1555_v31, 4 }
 0x3f2   : > { %v1404_v47 = vadd.f32 %v1403_v51, %v1294_v25  ;;  %v1413_v34 = vadd.f32 %v1412_v52, %v1295_v58  ;;  %v1564_v8 = vmax.f32 %v1563_v16, %v1294_v25  ;;  %v1573_v0 = vmax.f32 %v1572_v46, %v1295_v58 }
 0x3f3   : > { %v1389_v33 = vrot.slane %v1388_v30, 2  ;;  %v1397_v48 = vadd.f32 %v1396_v44, %v1395_v28  ;;  %v1549_v53 = vrot.slane %v1548_v40, 2  ;;  %v1557_v22 = vmax.f32 %v1555_v31, %v1556_v42  ;;  %v1228_v42 = vpop.permute.xlu0 %1227 }
 0x3f4   : > { %v1405_v59 = vrot.slane %v1404_v47, 4  ;;  %v1414_v24 = vrot.slane %v1413_v34, 4  ;;  %v1565_v54 = vrot.slane %v1564_v8, 4  ;;  %v1574_v61 = vrot.slane %v1573_v0, 4 }
 0x3f5   : > { %v1390_v62 = vadd.f32 %v1389_v33, %v1388_v30  ;;  %v1398_v41 = vrot.slane %v1397_v48, 2  ;;  %v1550_v23 = vmax.f32 %v1548_v40, %v1549_v53  ;;  %v1558_v3 = vrot.slane %v1557_v22, 2  ;;  %v2609_v53 = vld [vmem:[%s2922_s20 + $0x1a0] sm:$0xff] }
 0x3f6   : > { %v1406_v49 = vadd.f32 %v1405_v59, %v1404_v47  ;;  %v1415_v9 = vadd.f32 %v1414_v24, %v1413_v34  ;;  %v1566_v38 = vmax.f32 %v1564_v8, %v1565_v54  ;;  %v1575_v10 = vmax.f32 %v1573_v0, %v1574_v61  ;;  %v2610_v59 = vld [vmem:[%s2922_s20 + $0x1a8] sm:$0xff] }
 0x3f7   : > { %v1391_v51 = vrot.slane %v1390_v62, 1  ;;  %v1399_v52 = vadd.f32 %v1398_v41, %v1397_v48  ;;  %v1551_v16 = vrot.slane %v1550_v23, 1  ;;  %v1559_v46 = vmax.f32 %v1557_v22, %v1558_v3  ;;  %v1247_v41 = vpop.permute.xlu1 %1246 }
 0x3f8   : > { %v1407_v17 = vrot.slane %v1406_v49, 2  ;;  %v1416_v20 = vrot.slane %v1415_v9, 2  ;;  %v1567_v27 = vrot.slane %v1566_v38, 2  ;;  %v1576_v29 = vrot.slane %v1575_v10, 2 }
 0x3f9   : > { %v1392_v6 = vadd.f32 %v1391_v51, %v1390_v62  ;;  %v1400_v7 = vrot.slane %v1399_v52, 1  ;;  %v1552_v25 = vmax.f32 %v1550_v23, %v1551_v16  ;;  %v1560_v12 = vrot.slane %v1559_v46, 1  ;;  %v2613_v51 = vld [vmem:[%s2922_s20 + $0x1e0] sm:$0xff] }
 0x3fa   : > { %v1408_v58 = vadd.f32 %v1407_v17, %v1406_v49  ;;  %v1417_v45 = vadd.f32 %v1416_v20, %v1415_v9  ;;  %v1568_v28 = vmax.f32 %v1566_v38, %v1567_v27  ;;  %v1577_v56 = vmax.f32 %v1575_v10, %v1576_v29  ;;  %v2612_v38 = vld [vmem:[%s2922_s20 + $0x1b8] sm:$0xff]  ;;  %v2615_v17 = vld [vmem:[%s2922_s20 + $0x1f0] sm:$0xff] }
 0x3fb   : > { %v1401_v31 = vadd.f32 %v1400_v7, %v1399_v52  ;;  %v3646_v30 = vmul.f32 0.03125, %v1392_v6  ;;  %v3648_v44 = vmax.f32 %v1559_v46, %v1560_v12  ;;  %v1607_v40 = vmax.f32 %v3607_v5, %v3628_v15  ;;  %v2611_v15 = vld [vmem:[%s2922_s20 + $0x1b0] sm:$0xff] }
 0x3fc   : > { %v1409_v47 = vrot.slane %v1408_v58, 1  ;;  %v1418_v34 = vrot.slane %v1417_v45, 1  ;;  %v1569_v8 = vrot.slane %v1568_v28, 1  ;;  %v1578_v0 = vrot.slane %v1577_v56, 1 }
 0x3fd   : > { %v3652_v33 = vmul.f32 0.03125, %v1401_v31  ;;  %v3656_v48 = vsel %vm717_vm6, %v1552_v25, %v3611_v19  ;;  %v1300_v22 = vmul.f32 %v2609_v53, %v1224_v1  ;;  %v1301_v24 = vmul.f32 %v2610_v59, %v1224_v1  ;;  %v2616_v25 = vld [vmem:[%s2922_s20 + $0x1f8] sm:$0xff] }
 0x3fe   : > { %v1410_v54 = vadd.f32 %v1409_v47, %v1408_v58  ;;  %v1419_v61 = vadd.f32 %v1418_v34, %v1417_v45  ;;  %v3660_v5 = vmax.f32 %v1568_v28, %v1569_v8  ;;  %v1302_v62 = vmul.f32 %v2611_v15, %v1228_v42 }
 0x3ff   : > { %v1421_v23 = vadd.f32 %v3587_v21, %v1300_v22  ;;  %v1430_v19 = vadd.f32 %v3591_v13, %v1301_v24  ;;  %v1581_v3 = vmax.f32 %v1580_v55, %v1300_v22  ;;  %v1590_v1 = vmax.f32 %v1589_v14, %v1301_v24  ;;  %v2614_v13 = vld [vmem:[%s2922_s20 + $0x1e8] sm:$0xff] }
 0x400   : > { %v3671_v49 = vmul.f32 0.03125, %v1410_v54  ;;  %v3673_v9 = vmax.f32 %v1577_v56, %v1578_v0  ;;  %v1303_v10 = vmul.f32 %v2612_v38, %v1228_v42  ;;  %v1308_v52 = vmul.f32 %v2613_v51, %v1243_v2 }
 0x401   : > { %v1422_v16 = vadd.f32 %v1421_v23, %v1302_v62  ;;  %v1582_v21 = vmax.f32 %v1581_v3, %v1302_v62  ;;  %v1309_v46 = vmul.f32 %v2614_v13, %v1243_v2  ;;  %v1310_v57 = vmul.f32 %v2615_v17, %v1247_v41 }
 0x402   : > { %v3679_v18 = vmul.f32 0.03125, %v1419_v61  ;;  %v1431_v55 = vadd.f32 %v1430_v19, %v1303_v10  ;;  %v1591_v11 = vmax.f32 %v1590_v1, %v1303_v10  ;;  %v1439_v36 = vadd.f32 %v3638_v39, %v1308_v52 }
 0x403   : > { %v1423_v14 = vrot.slane %v1422_v16, 4  ;;  %v1583_v20 = vrot.slane %v1582_v21, 4  ;;  %v1448_v27 = vadd.f32 %v3642_v43, %v1309_v46  ;;  %v1599_v29 = vmax.f32 %v1598_v35, %v1308_v52 }
 0x404   : > { %v1432_v6 = vrot.slane %v1431_v55, 4  ;;  %v1592_v7 = vrot.slane %v1591_v11, 4  ;;  %v1311_v2 = vmul.f32 %v2616_v25, %v1247_v41  ;;  %v1440_v12 = vadd.f32 %v1439_v36, %v1310_v57 }
 0x405   : > { %v1424_v58 = vadd.f32 %v1423_v14, %v1422_v16  ;;  %v1584_v45 = vmax.f32 %v1582_v21, %v1583_v20  ;;  %v1608_v28 = vmax.f32 %v1607_v40, %v1309_v46  ;;  %v1600_v56 = vmax.f32 %v1599_v29, %v1310_v57 }
 0x406   : > { %v1433_v31 = vadd.f32 %v1432_v6, %v1431_v55  ;;  %v1593_v42 = vmax.f32 %v1591_v11, %v1592_v7  ;;  %v1441_v39 = vrot.slane %v1440_v12, 4  ;;  %v1449_v47 = vadd.f32 %v1448_v27, %v1311_v2 }
 0x407   : > { %v1425_v34 = vrot.slane %v1424_v58, 2  ;;  %v1585_v8 = vrot.slane %v1584_v45, 2  ;;  %v1601_v43 = vrot.slane %v1600_v56, 4  ;;  %v1609_v0 = vmax.f32 %v1608_v28, %v1311_v2 }
 0x408   : > { %v1434_v53 = vrot.slane %v1433_v31, 2  ;;  %v1594_v50 = vrot.slane %v1593_v42, 2  ;;  %v1442_v4 = vadd.f32 %v1441_v39, %v1440_v12  ;;  %v1450_v35 = vrot.slane %v1449_v47, 4 }
 0x409   : > { %v1426_v22 = vadd.f32 %v1425_v34, %v1424_v58  ;;  %v1586_v59 = vmax.f32 %v1584_v45, %v1585_v8  ;;  %v1602_v24 = vmax.f32 %v1600_v56, %v1601_v43  ;;  %v1610_v54 = vrot.slane %v1609_v0, 4 }
 0x40a   : > { %v1435_v61 = vadd.f32 %v1434_v53, %v1433_v31  ;;  %v1595_v15 = vmax.f32 %v1593_v42, %v1594_v50  ;;  %v1443_v40 = vrot.slane %v1442_v4, 2  ;;  %v1451_v62 = vadd.f32 %v1450_v35, %v1449_v47 }
 0x40b   : > { %v1427_v41 = vrot.slane %v1426_v22, 1  ;;  %v1587_v23 = vrot.slane %v1586_v59, 1  ;;  %v1603_v19 = vrot.slane %v1602_v24, 2  ;;  %v1611_v3 = vmax.f32 %v1609_v0, %v1610_v54 }
 0x40c   : > { %v1436_v1 = vrot.slane %v1435_v61, 1  ;;  %v1596_v38 = vrot.slane %v1595_v15, 1  ;;  %v1444_v10 = vadd.f32 %v1443_v40, %v1442_v4  ;;  %v1452_v51 = vrot.slane %v1451_v62, 2 }
 0x40d   : > { %v1428_v52 = vadd.f32 %v1427_v41, %v1426_v22  ;;  %v1604_v16 = vmax.f32 %v1602_v24, %v1603_v19  ;;  %v1612_v21 = vrot.slane %v1611_v3, 2  ;;  %v1673_v13 = vsel %vm715_vm5, %v3597_v60, %v3573_v37 }
 0x40e   : > { %v1437_v46 = vadd.f32 %v1436_v1, %v1435_v61  ;;  %v1588_v17 = vmax.f32 %v1586_v59, %v1587_v23  ;;  %v1445_v57 = vrot.slane %v1444_v10, 1  ;;  %v1453_v55 = vadd.f32 %v1452_v51, %v1451_v62 }
 0x40f   : > { %v1468_v11 = vmul.f32 0.03125, %v1428_v52  ;;  %v1597_v36 = vmax.f32 %v1595_v15, %v1596_v38  ;;  %v1605_v14 = vrot.slane %v1604_v16, 1  ;;  %v1613_v20 = vmax.f32 %v1611_v3, %v1612_v21 }
 0x410   : > { %v1469_v27 = vmul.f32 0.03125, %v1437_v46  ;;  %v1446_v29 = vadd.f32 %v1445_v57, %v1444_v10  ;;  %v1454_v6 = vrot.slane %v1453_v55, 1  ;;  %v1674_v7 = vsel %vm717_vm6, %v3648_v44, %v1673_v13 }
 0x411   : > { %v1606_v25 = vmax.f32 %v1604_v16, %v1605_v14  ;;  %v1614_v2 = vrot.slane %v1613_v20, 1  ;;  %v1675_v12 = vsel %vm719_vm7, %v3673_v9, %v1674_v7  ;;  %v1668_v37 = vsel %vm719_vm7, %v3660_v5, %v3656_v48 }
 0x412   : > { %v1455_v60 = vadd.f32 %v1454_v6, %v1453_v55  ;;  %v1470_v58 = vmul.f32 0.03125, %v1446_v29  ;;  %v1669_v45 = vsel %vm721_vm8, %v1588_v17, %v1668_v37  ;;  %v1641_v28 = vsel %vm715_vm5, %v3604_v63, %v3583_v32 }
 0x413   : > { %v1615_v56 = vmax.f32 %v1613_v20, %v1614_v2  ;;  %v1670_v44 = vsel %vm723_vm9, %v1606_v25, %v1669_v45  ;;  %v1642_v31 = vsel %vm717_vm6, %v3652_v33, %v1641_v28  ;;  %v1635_v9 = vsel %vm717_vm6, %v3646_v30, %v3634_v26 }
 0x414   : > { %v1676_v48 = vsel %vm721_vm8, %v1597_v36, %v1675_v12  ;;  %v1471_v5 = vmul.f32 0.03125, %v1455_v60  ;;  %v1643_v42 = vsel %vm719_vm7, %v3679_v18, %v1642_v31  ;;  %v1636_v39 = vsel %vm719_vm7, %v3671_v49, %v1635_v9 }
 0x415   : > { %v1677_v32 = vsel %vm723_vm9, %v1615_v56, %v1676_v48  ;;  %v1682_v63 = vpack.c.bf16 %v1670_v44, %v1670_v44  ;;  %v1644_v47 = vsel %vm721_vm8, %v1469_v27, %v1643_v42  ;;  %v1637_v33 = vsel %vm721_vm8, %v1468_v11, %v1636_v39 }
 0x416   : > { %v1683_v34 = vpack.c.bf16 %v1677_v32, %v1677_v32  ;;  %v1645_v8 = vsel %vm723_vm9, %v1471_v5, %v1644_v47  ;;  %v1638_v26 = vsel %vm723_vm9, %v1470_v58, %v1637_v33 }
 0x417   : > { %v1681_v30 = vpack.c.bf16 %v1645_v8, %v1645_v8  ;;  %v1680_v43 = vpack.c.bf16 %v1638_v26, %v1638_v26 }
 0x418   : > { %2141 = vmatprep.mubr.bf16.mxu1 %v1683_v34 }
 0x419   : > { %2142 = vmatmul.mubr.bf16.vlgmr.msra.gmra.mrb[4].mxu1 %v1682_v63  ;;  %2100 = vmatprep.mubr.bf16.mxu0 %v1681_v30 }
 0x41a   : > { %2101 = vmatmul.mubr.bf16.vlgmr.msra.gmra.mrb[4].mxu0 %v1680_v43 }
 0x4ec   : > { %v2143_v18 = vpop.f32.mrb[4].mxu1 }
 0x4ed   : > { %v2145_v49 = vpop.f32.mrb[5].mxu1  ;;  %v2102_v0 = vpop.f32.mrb[4].mxu0 }
 0x4ee   : > { %v2144_v53 = vadd.f32 %v2143_v18, %v2102_v0  ;;  %v2147_v50 = vpop.f32.mrb[6].mxu1  ;;  %v2104_v4 = vpop.f32.mrb[5].mxu0 }
 0x4ef   : > { %v2146_v35 = vadd.f32 %v2145_v49, %v2104_v4  ;;  %v2148_v22 = vpop.f32.mrb[7].mxu1  ;;  %v2106_v59 = vpop.f32.mrb[6].mxu0 }
 0x4f0   : > { %v2340_v24 = vmul.f32 -1.442695, %v2144_v53  ;;  %v2107_v54 = vpop.f32.mrb[7].mxu0 }
 0x4f1   : > { %v2341_v61 = vmul.f32 -1.442695, %v2146_v35 }
 0x4f2   : > { %2545 = vpow2.f32 %v2340_v24 }
 0x4f3   : > { %2547 = vpow2.f32 %v2341_v61 }
 0x4fc   : > { %v2546_v15 = vpop.eup %2545 }
 0x4fd   : > { %v2548_v40 = vpop.eup %2547  ;;  %v2156_v62 = vadd.f32 1.0, %v2546_v15 }
 0x4fe   : > { %v2157_v41 = vadd.f32 1.0, %v2548_v40 }
 0x4ff   : > { %2549 = vrcp.f32 %v2156_v62 }
 0x500   : > { %2551 = vrcp.f32 %v2157_v41 }
 0x509   : > { %v2550_v23 = vpop.eup %2549 }
 0x50a   : > { %v2552_v19 = vpop.eup %2551  ;;  %2162 = vst [vmem:[%s230_s11] sm:$0xff] %v2550_v23 }
 0x50b   : > { %2163 = vst [vmem:[%s230_s11 + $0x8] sm:$0xff] %v2552_v19 }
 0x50c   : > { %2688 = shalt.err (!%p2685_p7)
}
 0x50d   : > { %s2689_s12 = scalar_lea.hbm %s3722_s21, 256  ;;  %s2693_s5 = scalar_lea.hbm %s3770_s4, 512 }
 0x50e   : > { %p2690_p9 = scmp.ne.s32.totalorder %s3722_s21, %s2689_s12  ;;  %p2694_p5 = scmp.lt.u32.totalorder %s3722_s21, %s3770_s4 }
 0x50f   : > { %p2695_p11 = scmp.lt.u32.totalorder %s2693_s5, %s2689_s12  ;;  %p2697_p4 = scmp.lt.u32.totalorder %s2689_s12, %s3722_s21 }
 0x510   : > { %p2691_p2 = pnand %p2690_p9, %p2870_p12 }
 0x511   : > { %p2696_p1 = por %p2695_p11, %p2694_p5 }
 0x512   : > { %p2692_p0 = pneg %p2691_p2 }
 0x513   : > { %p2698_p6 = por %p2697_p4, %p2696_p1 }
 0x515   : > { %p2699_p8 = pnand %p2698_p6, %p2692_p0 }
 0x517   : > { %2702 = shalt.err (!%p2699_p8)
}
 0x518   : > { %2390 = dma.vmem_to_hbm [thread:$0]  (%p2870_p12), %s3724_s13, 256, %s3722_s21, %s2165_s23  }
 0x519 PF: > { %s2191_s8 = sand.u32 1, %s2733_s15   ;;  %p3785_p10 = scmp.ne.s32.totalorder %s3775_s22, 0 }
 0x51a   : > { %p3786_p13 = scmp.ge.s32.totalorder %s2745_s18, 2  ;;  %s2192_s25 = scalar_lea.sflag [#allocation4], %s2191_s8 }
 0x51c   : > { %p2401_p3 = pnand %p3786_p13, %p3785_p10 }
 0x51e   : > { %2728 = dma.done.wait (!%p2401_p3), %s2192_s25, 256  }
 0x51f   : > { %2730 = vsyncadd (!%p2401_p3), %s2192_s25, 4294967040  ;;  %p18_p7 = scmp.ge.s32.totalorder %s2835_s27, 4   ;;  %s3787_s15 = smov %s2737_s16 }
 0x520   : > { %s3788_s16 = smov %s2741_s17  ;;  %s3789_s17 = smov %s2866_s24 }
 0x521   : > { %s3790_s18 = smov %s2835_s27  ;;  %20 = sbr.rel (!%p18_p7) target bundleno = 6 (0x6), region = 85 }
 0x528   :  { %2197 = vsyncpa [#allocation3], 1 }
 0x529   :  { %2199 = vsyncpa [#allocation3 + $0x1], 1 }
 0x52a   :  { %2200 = vsyncpa [#allocation6], 1 }
 0x52b   :  { %2201 = vsyncpa [#allocation4], 1 }
 0x52c   :  { %2203 = vsyncpa [#allocation4 + $0x1], 1 }

</bundles_post_ra>
